<compile_context>
chip_gen: v7x
topology: tpu7x:2x2x1
jax: 0.10.0
libtpu: 0.0.40
codegen_flags: <defaults>
</compile_context>

<pallas_src>
import functools
import math

import jax
import jax.numpy as jnp
from jax.experimental import pallas as pl
from jax.experimental.pallas import tpu as pltpu

# ---- small synthetic config (bert-base uses H=768, 12 layers, 12 heads) ----
VOCAB = 128
HIDDEN = 128
N_LAYERS = 2
N_HEADS = 2
HEAD_DIM = HIDDEN // N_HEADS
INTERMEDIATE = 256
MAX_POS = 16
CLASS_NUM = 4
CLS_PAD = 128            # lane-dense padded width for the classifier output
LN_EPS = 1e-12

# attention head grouping: process enough heads per grid step that each
# group's Q/K/V slab is a lane-dense 128-wide tile (2 heads at Dh=64).
HEADS_PER_GROUP = max(1, min(N_HEADS, 128 // HEAD_DIM))
assert N_HEADS % HEADS_PER_GROUP == 0
N_GROUPS = N_HEADS // HEADS_PER_GROUP
GROUP_W = HEADS_PER_GROUP * HEAD_DIM


# ---- per-generation tile table (re-derived from physical VMEM capacity) ----
def _vmem_capacity_bytes():
    try:
        return int(pltpu.get_tpu_info().vmem_capacity_bytes)
    except Exception:
        return 64 * 1024 * 1024          # conservative (v7x-sized) fallback


_VMEM_CAP = _vmem_capacity_bytes()
if _VMEM_CAP >= 100 * 1024 * 1024:       # v5e / v6e: 128 MiB physical VMEM
    TM_CAP, TN_CAP, TK_CAP = 512, 1024, 1024
    VMEM_LIMIT = 64 * 1024 * 1024
else:                                    # v7x: 64 MiB physical VMEM
    TM_CAP, TN_CAP, TK_CAP = 512, 512, 768
    VMEM_LIMIT = 40 * 1024 * 1024
# TODO(synk): if DMA-exposed on v5e after tile enlargement, add
#             pipeline_mode=pl.Buffered(3) on the streamed weight BlockSpec.


def _choose_tile(dim, cap):
    """Largest tile <= cap that divides `dim` exactly (no ragged blocks)."""
    if dim <= cap:
        return dim
    for t in range(cap, 0, -1):
        if dim % t == 0:
            return t
    return dim


# ----------------------------- Pallas kernels ------------------------------

def _linear_kernel(x_ref, w_ref, b_ref, o_ref, acc_ref, *, activation):
    """Tiled y = act(x @ w + b); grid = (M/tm, N/tn, K/tk), k innermost."""
    k = pl.program_id(2)

    @pl.when(k == 0)
    def _():
        acc_ref[...] = jnp.zeros_like(acc_ref)

    acc_ref[...] += jnp.dot(x_ref[...], w_ref[...],
                            preferred_element_type=jnp.float32)

    @pl.when(k == pl.num_programs(2) - 1)
    def _():
        y = acc_ref[...] + b_ref[...]            # f32 epilogue (v5e-safe)
        if activation == "relu":
            y = jnp.maximum(y, 0.0)
        elif activation == "gelu":
            # TODO(synk): bert-base uses erf-GELU; tanh approximation used here.
            y = jax.nn.gelu(y, approximate=True)
        elif activation == "tanh":
            y = jnp.tanh(y)
        o_ref[...] = y.astype(o_ref.dtype)


def _linear_res_ln_kernel(x_ref, w_ref, b_ref, res_ref, g_ref, be_ref,
                          o_ref, acc_ref):
    """Tiled y = LayerNorm(residual + x @ w + b); grid = (M/tm, K/tk)."""
    k = pl.program_id(1)

    @pl.when(k == 0)
    def _():
        acc_ref[...] = jnp.zeros_like(acc_ref)

    acc_ref[...] += jnp.dot(x_ref[...], w_ref[...],
                            preferred_element_type=jnp.float32)

    @pl.when(k == pl.num_programs(1) - 1)
    def _():
        y = acc_ref[...] + b_ref[...] + res_ref[...].astype(jnp.float32)
        mean = jnp.mean(y, axis=-1, keepdims=True)
        yc = y - mean
        var = jnp.mean(yc * yc, axis=-1, keepdims=True)
        inv = jax.lax.rsqrt(var + LN_EPS)
        o_ref[...] = ((yc * inv) * g_ref[...] + be_ref[...]).astype(o_ref.dtype)


def _layernorm_kernel(x_ref, g_ref, b_ref, o_ref):
    x = x_ref[...].astype(jnp.float32)           # stats in f32
    mean = jnp.mean(x, axis=-1, keepdims=True)
    xc = x - mean
    var = jnp.mean(xc * xc, axis=-1, keepdims=True)
    inv = jax.lax.rsqrt(var + LN_EPS)
    o_ref[...] = ((xc * inv) * g_ref[...] + b_ref[...]).astype(o_ref.dtype)


def _qkv_attn_kernel(mask_ref, x_ref, wq_ref, wk_ref, wv_ref,
                     bq_ref, bk_ref, bv_ref, o_ref,
                     *, heads_per_group, head_dim, scale):
    """Fused QKV projection + attention for one (batch, head-group) tile.

    x_ref: (S, H) bf16, wq/wk/wv_ref: (H, GROUP_W) bf16 column slabs,
    output: (S, GROUP_W) bf16 context written in token-major layout.
    """
    x = x_ref[...]                                            # (S, H) bf16
    # additive mask computed in-kernel from the raw (1, S) mask row
    neg = (1.0 - mask_ref[0].astype(jnp.float32)) * -1e9      # (1, S)

    # in-kernel QKV projection (no HBM round-trip for the QKV activations)
    q = (jnp.dot(x, wq_ref[...], preferred_element_type=jnp.float32)
         + bq_ref[...]).astype(x.dtype)                       # (S, GW)
    k = (jnp.dot(x, wk_ref[...], preferred_element_type=jnp.float32)
         + bk_ref[...]).astype(x.dtype)
    v = (jnp.dot(x, wv_ref[...], preferred_element_type=jnp.float32)
         + bv_ref[...]).astype(x.dtype)

    ctx = []
    for h in range(heads_per_group):                          # tiny unroll (2)
        lo = h * head_dim
        qh = q[:, lo:lo + head_dim]
        kh = k[:, lo:lo + head_dim]
        vh = v[:, lo:lo + head_dim]
        # contract over Dh without materializing k.T
        s = jax.lax.dot_general(qh, kh, (((1,), (1,)), ((), ())),
                                preferred_element_type=jnp.float32)
        s = s * scale + neg                                   # (S, S) f32
        s_max = jnp.max(s, axis=-1, keepdims=True)
        p = jnp.exp(s - s_max)
        denom = jnp.sum(p, axis=-1, keepdims=True)
        p = p * pl.reciprocal(denom, approx=True)             # EUP divide
        ctx.append(jnp.dot(p.astype(vh.dtype), vh,
                           preferred_element_type=jnp.float32))
    # lane-dense (S, GROUP_W) store (no merge-head transpose through HBM)
    o_ref[...] = jnp.concatenate(ctx, axis=-1).astype(o_ref.dtype)


def _pooler_cls_kernel(cls_ref, wp_ref, bp_ref, wc_ref, bc_ref, o_ref):
    """Fused BERT pooler + classifier head (single launch, tiny shapes)."""
    pooled = jnp.tanh(jnp.dot(cls_ref[...], wp_ref[...],
                              preferred_element_type=jnp.float32)
                      + bp_ref[...])                          # (B, H) f32
    logits = (jnp.dot(pooled.astype(wc_ref.dtype), wc_ref[...],
                      preferred_element_type=jnp.float32) + bc_ref[...])
    o_ref[...] = jnp.maximum(logits, 0.0).astype(o_ref.dtype)


# ------------------------------ kernel wrappers -----------------------------

def pallas_linear(x, w, b, activation="none"):
    M, K = x.shape
    N = w.shape[1]
    tm = _choose_tile(M, TM_CAP)
    tn = _choose_tile(N, TN_CAP)
    tk = _choose_tile(K, TK_CAP)          # tk | K -> no ragged K blocks
    grid = (M // tm, N // tn, K // tk)
    return pl.pallas_call(
        functools.partial(_linear_kernel, activation=activation),
        grid_spec=pltpu.PrefetchScalarGridSpec(
            num_scalar_prefetch=0, grid=grid,
            in_specs=[pl.BlockSpec((tm, tk), lambda i, j, k: (i, k)),
                      pl.BlockSpec((tk, tn), lambda i, j, k: (k, j)),
                      pl.BlockSpec((1, tn), lambda i, j, k: (0, j))],
            out_specs=pl.BlockSpec((tm, tn), lambda i, j, k: (i, j)),
            scratch_shapes=[pltpu.VMEM((tm, tn), jnp.float32)]),
        out_shape=jax.ShapeDtypeStruct((M, N), jnp.bfloat16),
        compiler_params=pltpu.CompilerParams(
            dimension_semantics=("parallel", "parallel", "arbitrary"),
            vmem_limit_bytes=VMEM_LIMIT),
    )(x.astype(jnp.bfloat16), w.astype(jnp.bfloat16),
      b.reshape(1, N).astype(jnp.float32))


def pallas_linear_residual_ln(x, w, b, residual, gamma, beta):
    """LayerNorm(residual + x @ w + b) with LN fused into the matmul epilogue."""
    M, K = x.shape
    N = w.shape[1]                                  # full hidden width per tile
    tm = _choose_tile(M, TM_CAP)
    tk = _choose_tile(K, TK_CAP)
    grid = (M // tm, K // tk)
    return pl.pallas_call(
        _linear_res_ln_kernel,
        grid_spec=pltpu.PrefetchScalarGridSpec(
            num_scalar_prefetch=0, grid=grid,
            in_specs=[pl.BlockSpec((tm, tk), lambda i, k: (i, k)),
                      pl.BlockSpec((tk, N), lambda i, k: (k, 0)),
                      pl.BlockSpec((1, N), lambda i, k: (0, 0)),
                      pl.BlockSpec((tm, N), lambda i, k: (i, 0)),
                      pl.BlockSpec((1, N), lambda i, k: (0, 0)),
                      pl.BlockSpec((1, N), lambda i, k: (0, 0))],
            out_specs=pl.BlockSpec((tm, N), lambda i, k: (i, 0)),
            scratch_shapes=[pltpu.VMEM((tm, N), jnp.float32)]),
        out_shape=jax.ShapeDtypeStruct((M, N), jnp.bfloat16),
        compiler_params=pltpu.CompilerParams(
            dimension_semantics=("parallel", "arbitrary"),
            vmem_limit_bytes=VMEM_LIMIT),
    )(x.astype(jnp.bfloat16), w.astype(jnp.bfloat16),
      b.reshape(1, N).astype(jnp.float32),
      residual.astype(jnp.bfloat16),
      gamma.reshape(1, N).astype(jnp.float32),
      beta.reshape(1, N).astype(jnp.float32))


def pallas_layernorm(x, gamma, beta):
    # Used once (embeddings).  TODO(synk): could be folded into the first
    # layer's fused attention prologue, but it must materialize anyway because
    # the post-LN activations are the residual input of the first o-proj LN.
    M, H = x.shape
    tm = _choose_tile(M, TM_CAP)
    return pl.pallas_call(
        _layernorm_kernel,
        grid_spec=pltpu.PrefetchScalarGridSpec(
            num_scalar_prefetch=0, grid=(M // tm,),
            in_specs=[pl.BlockSpec((tm, H), lambda i: (i, 0)),
                      pl.BlockSpec((1, H), lambda i: (0, 0)),
                      pl.BlockSpec((1, H), lambda i: (0, 0))],
            out_specs=pl.BlockSpec((tm, H), lambda i: (i, 0))),
        out_shape=jax.ShapeDtypeStruct((M, H), jnp.bfloat16),
        compiler_params=pltpu.CompilerParams(
            dimension_semantics=("parallel",),
            vmem_limit_bytes=VMEM_LIMIT),
    )(x.astype(jnp.bfloat16), gamma.reshape(1, H).astype(jnp.float32),
      beta.reshape(1, H).astype(jnp.float32))


def pallas_qkv_attention(x, wq, wk, wv, bq, bk, bv, mask_f, B, S):
    """Fused QKV projection + attention.

    x: (B*S, H) bf16, wq/wk/wv: (H, H), mask_f: (B, 1, S) f32 {0,1}.
    grid = (B, n_head_groups) — both parallel (megacore-friendly on v7x).
    """
    H = HIDDEN
    return pl.pallas_call(
        functools.partial(_qkv_attn_kernel,
                          heads_per_group=HEADS_PER_GROUP,
                          head_dim=HEAD_DIM,
                          scale=1.0 / math.sqrt(HEAD_DIM)),
        grid_spec=pltpu.PrefetchScalarGridSpec(
            num_scalar_prefetch=0, grid=(B, N_GROUPS),
            in_specs=[
                pl.BlockSpec((1, 1, S), lambda b, g: (b, 0, 0)),
                pl.BlockSpec((S, H), lambda b, g: (b, 0)),
                pl.BlockSpec((H, GROUP_W), lambda b, g: (0, g)),
                pl.BlockSpec((H, GROUP_W), lambda b, g: (0, g)),
                pl.BlockSpec((H, GROUP_W), lambda b, g: (0, g)),
                pl.BlockSpec((1, GROUP_W), lambda b, g: (0, g)),
                pl.BlockSpec((1, GROUP_W), lambda b, g: (0, g)),
                pl.BlockSpec((1, GROUP_W), lambda b, g: (0, g)),
            ],
            out_specs=pl.BlockSpec((S, GROUP_W), lambda b, g: (b, g))),
        out_shape=jax.ShapeDtypeStruct((B * S, H), jnp.bfloat16),
        compiler_params=pltpu.CompilerParams(
            dimension_semantics=("parallel", "parallel"),
            vmem_limit_bytes=VMEM_LIMIT),
    )(mask_f, x.astype(jnp.bfloat16),
      wq.astype(jnp.bfloat16), wk.astype(jnp.bfloat16), wv.astype(jnp.bfloat16),
      bq.reshape(1, H).astype(jnp.float32),
      bk.reshape(1, H).astype(jnp.float32),
      bv.reshape(1, H).astype(jnp.float32))


def pallas_pooler_classifier(cls_tok, wp, bp, wc_pad, bc_pad):
    """relu(linear(tanh(pooler(cls_tok)))) in one launch (lane-dense output)."""
    B, H = cls_tok.shape
    NP = wc_pad.shape[1]
    return pl.pallas_call(
        _pooler_cls_kernel,
        grid_spec=pltpu.PrefetchScalarGridSpec(
            num_scalar_prefetch=0, grid=(1,),
            in_specs=[pl.BlockSpec((B, H), lambda i: (0, 0)),
                      pl.BlockSpec((H, H), lambda i: (0, 0)),
                      pl.BlockSpec((1, H), lambda i: (0, 0)),
                      pl.BlockSpec((H, NP), lambda i: (0, 0)),
                      pl.BlockSpec((1, NP), lambda i: (0, 0))],
            out_specs=pl.BlockSpec((B, NP), lambda i: (0, 0))),
        out_shape=jax.ShapeDtypeStruct((B, NP), jnp.float32),
        compiler_params=pltpu.CompilerParams(
            dimension_semantics=("arbitrary",),
            vmem_limit_bytes=VMEM_LIMIT),
    )(cls_tok.astype(jnp.bfloat16), wp.astype(jnp.bfloat16),
      bp.reshape(1, H).astype(jnp.float32), wc_pad.astype(jnp.bfloat16),
      bc_pad.reshape(1, NP).astype(jnp.float32))


# ----------------------------- parameter init ------------------------------

def init_params(key):
    keys = jax.random.split(key, 32)
    kit = iter(keys)

    def dense(d_in, d_out):
        return {"w": 0.02 * jax.random.normal(next(kit), (d_in, d_out), jnp.float32),
                "b": jnp.zeros((d_out,), jnp.float32)}

    params = {
        "word_emb": 0.02 * jax.random.normal(next(kit), (VOCAB, HIDDEN), jnp.float32),
        "pos_emb": 0.02 * jax.random.normal(next(kit), (MAX_POS, HIDDEN), jnp.float32),
        "type_emb": 0.02 * jax.random.normal(next(kit), (2, HIDDEN), jnp.float32),
        "emb_ln_g": jnp.ones((HIDDEN,), jnp.float32),
        "emb_ln_b": jnp.zeros((HIDDEN,), jnp.float32),
        "layers": [],
        "pooler": dense(HIDDEN, HIDDEN),
        "cls": dense(HIDDEN, CLASS_NUM),   # self.linear = nn.Linear(768, class_num)
    }
    for _ in range(N_LAYERS):
        params["layers"].append({
            "q": dense(HIDDEN, HIDDEN),
            "k": dense(HIDDEN, HIDDEN),
            "v": dense(HIDDEN, HIDDEN),
            "o": dense(HIDDEN, HIDDEN),
            "ln1_g": jnp.ones((HIDDEN,), jnp.float32),
            "ln1_b": jnp.zeros((HIDDEN,), jnp.float32),
            "ffn_in": dense(HIDDEN, INTERMEDIATE),
            "ffn_out": dense(INTERMEDIATE, HIDDEN),
            "ln2_g": jnp.ones((HIDDEN,), jnp.float32),
            "ln2_b": jnp.zeros((HIDDEN,), jnp.float32),
        })
    return params


# ------------------------------ forward pass -------------------------------

def bert_classifier_forward(params, input_ids, attention_mask):
    B, S = input_ids.shape

    # --- embeddings (gather is glue in plain JAX) ---
    emb = (params["word_emb"][input_ids]
           + params["pos_emb"][jnp.arange(S)][None, :, :]
           + params["type_emb"][jnp.zeros((B, S), jnp.int32)])
    x = pallas_layernorm(emb.reshape(B * S, HIDDEN),
                         params["emb_ln_g"], params["emb_ln_b"])   # (B*S, H) bf16

    # raw (B, 1, S) mask; the additive -1e9 mask is built inside the kernel
    mask_f = attention_mask.astype(jnp.float32).reshape(B, 1, S)

    for layer in params["layers"]:
        # fused QKV projection + attention (no (B*S, 3H) HBM round-trip)
        ctx = pallas_qkv_attention(
            x, layer["q"]["w"], layer["k"]["w"], layer["v"]["w"],
            layer["q"]["b"], layer["k"]["b"], layer["v"]["b"],
            mask_f, B, S)                                            # (B*S, H)
        # o-proj + residual + LayerNorm fused
        x = pallas_linear_residual_ln(ctx, layer["o"]["w"], layer["o"]["b"],
                                      x, layer["ln1_g"], layer["ln1_b"])
        h = pallas_linear(x, layer["ffn_in"]["w"], layer["ffn_in"]["b"],
                          activation="gelu")
        # ffn-out + residual + LayerNorm fused
        x = pallas_linear_residual_ln(h, layer["ffn_out"]["w"], layer["ffn_out"]["b"],
                                      x, layer["ln2_g"], layer["ln2_b"])

    # --- BERT pooler + classifier head, fused into one kernel ---
    # nn.Dropout is identity at inference (eval mode); TODO(synk): training-mode
    # dropout would use pltpu.prng_seed / stateful_bernoulli inside the kernel.
    cls_tok = x.reshape(B, S, HIDDEN)[:, 0, :]                       # (B, H)
    w_pad = jnp.zeros((HIDDEN, CLS_PAD), jnp.float32).at[:, :CLASS_NUM].set(
        params["cls"]["w"])
    b_pad = jnp.zeros((CLS_PAD,), jnp.float32).at[:CLASS_NUM].set(params["cls"]["b"])
    logits_pad = pallas_pooler_classifier(cls_tok, params["pooler"]["w"],
                                          params["pooler"]["b"], w_pad, b_pad)
    return logits_pad[:, :CLASS_NUM]                                 # (B, CLASS_NUM) f32


# ---------------------------------- main ------------------------------------

if __name__ == "__main__":
    key = jax.random.PRNGKey(0)
    k_param, k_ids = jax.random.split(key)

    B, S = 2, 8
    params = init_params(k_param)
    input_ids = jax.random.randint(k_ids, (B, S), 0, VOCAB, dtype=jnp.int32)
    attention_mask = jnp.array([[1, 1, 1, 1, 1, 1, 0, 0],
                                [1, 1, 1, 1, 1, 1, 1, 1]], dtype=jnp.int32)

    fwd = jax.jit(bert_classifier_forward)
    out = fwd(params, input_ids, attention_mask)
    jax.block_until_ready(out)
    assert out.shape == (B, CLASS_NUM)
    assert bool(jnp.all(out >= 0.0))  # ReLU output is non-negative
    print("KERNEL_OK")
</pallas_src>

<mosaic_0001>
module attributes {stable_mosaic.version = 11 : i64} {
  func.func @_layernorm_kernel(%arg0: i32, %arg1: memref<16x128xbf16, #tpu.memory_space<vmem>>, %arg2: memref<1x128xf32, #tpu.memory_space<vmem>>, %arg3: memref<1x128xf32, #tpu.memory_space<vmem>>, %arg4: memref<16x128xbf16, #tpu.memory_space<vmem>>) attributes {dimension_semantics = [#tpu.dimension_semantics<parallel>], iteration_bounds = array<i64: 1>, scalar_prefetch = 0 : i64, scratch_operands = 0 : i64, tpu.core_type = #tpu.core_type<tc>, window_params = [{transform_indices = @transform_0, window_bounds = array<i64: 16, 128>}, {pipeline_mode = #tpu.pipeline_mode<synchronous>, transform_indices = @transform_1, window_bounds = array<i64: 1, 128>}, {pipeline_mode = #tpu.pipeline_mode<synchronous>, transform_indices = @transform_2, window_bounds = array<i64: 1, 128>}, {transform_indices = @transform_3, window_bounds = array<i64: 16, 128>}]} {
    %c0 = arith.constant 0 : index
    %c0_0 = arith.constant 0 : index
    %0 = vector.load %arg1[%c0, %c0_0] : memref<16x128xbf16, #tpu.memory_space<vmem>>, vector<16x128xbf16>
    %1 = arith.extf %0 : vector<16x128xbf16> to vector<16x128xf32>
    %cst = arith.constant dense<0.000000e+00> : vector<16xf32>
    %2 = vector.multi_reduction <add>, %1, %cst [1] : vector<16x128xf32> to vector<16xf32>
    %3 = vector.shape_cast %2 : vector<16xf32> to vector<16x1xf32>
    %cst_1 = arith.constant 1.280000e+02 : f32
    %4 = vector.broadcast %cst_1 : f32 to vector<16x1xf32>
    %5 = arith.divf %3, %4 : vector<16x1xf32>
    %6 = vector.broadcast %5 : vector<16x1xf32> to vector<16x128xf32>
    %7 = arith.subf %1, %6 : vector<16x128xf32>
    %8 = arith.mulf %7, %7 : vector<16x128xf32>
    %cst_2 = arith.constant dense<0.000000e+00> : vector<16xf32>
    %9 = vector.multi_reduction <add>, %8, %cst_2 [1] : vector<16x128xf32> to vector<16xf32>
    %10 = vector.shape_cast %9 : vector<16xf32> to vector<16x1xf32>
    %cst_3 = arith.constant 1.280000e+02 : f32
    %11 = vector.broadcast %cst_3 : f32 to vector<16x1xf32>
    %12 = arith.divf %10, %11 : vector<16x1xf32>
    %cst_4 = arith.constant 9.99999996E-13 : f32
    %13 = vector.broadcast %cst_4 : f32 to vector<16x1xf32>
    %14 = arith.addf %12, %13 : vector<16x1xf32>
    %15 = math.rsqrt %14 : vector<16x1xf32>
    %16 = vector.broadcast %15 : vector<16x1xf32> to vector<16x128xf32>
    %17 = arith.mulf %7, %16 : vector<16x128xf32>
    %c0_5 = arith.constant 0 : index
    %c0_6 = arith.constant 0 : index
    %18 = vector.load %arg2[%c0_5, %c0_6] : memref<1x128xf32, #tpu.memory_space<vmem>>, vector<1x128xf32>
    %19 = vector.broadcast %18 : vector<1x128xf32> to vector<16x128xf32>
    %20 = arith.mulf %17, %19 : vector<16x128xf32>
    %c0_7 = arith.constant 0 : index
    %c0_8 = arith.constant 0 : index
    %21 = vector.load %arg3[%c0_7, %c0_8] : memref<1x128xf32, #tpu.memory_space<vmem>>, vector<1x128xf32>
    %22 = vector.broadcast %21 : vector<1x128xf32> to vector<16x128xf32>
    %23 = arith.addf %20, %22 : vector<16x128xf32>
    %24 = arith.truncf %23 : vector<16x128xf32> to vector<16x128xbf16>
    %c0_9 = arith.constant 0 : index
    %c0_10 = arith.constant 0 : index
    %25 = vector.load %arg4[%c0_9, %c0_10] : memref<16x128xbf16, #tpu.memory_space<vmem>>, vector<16x128xbf16>
    tpu.vector_store %arg4[%c0_9, %c0_10], %24 {strides = array<i32>} : memref<16x128xbf16, #tpu.memory_space<vmem>>, vector<16x128xbf16>,
    return
  }
  func.func @transform_0(%arg0: i32) -> (i32, i32) {
    %c0_i32 = arith.constant 0 : i32
    %c0_i32_0 = arith.constant 0 : i32
    return %arg0, %c0_i32 : i32, i32
  }
  func.func @transform_1(%arg0: i32) -> (i32, i32) {
    %c0_i32 = arith.constant 0 : i32
    %c0_i32_0 = arith.constant 0 : i32
    %c0_i32_1 = arith.constant 0 : i32
    return %c0_i32, %c0_i32_0 : i32, i32
  }
  func.func @transform_2(%arg0: i32) -> (i32, i32) {
    %c0_i32 = arith.constant 0 : i32
    %c0_i32_0 = arith.constant 0 : i32
    %c0_i32_1 = arith.constant 0 : i32
    return %c0_i32, %c0_i32_0 : i32, i32
  }
  func.func @transform_3(%arg0: i32) -> (i32, i32) {
    %c0_i32 = arith.constant 0 : i32
    %c0_i32_0 = arith.constant 0 : i32
    return %arg0, %c0_i32 : i32, i32
  }
}

module attributes {stable_mosaic.version = 11 : i64} {
  func.func @_linear_res_ln_kernel(%arg0: i32, %arg1: i32, %arg2: memref<16x128xbf16, #tpu.memory_space<vmem>>, %arg3: memref<128x128xbf16, #tpu.memory_space<vmem>>, %arg4: memref<1x128xf32, #tpu.memory_space<vmem>>, %arg5: memref<16x128xbf16, #tpu.memory_space<vmem>>, %arg6: memref<1x128xf32, #tpu.memory_space<vmem>>, %arg7: memref<1x128xf32, #tpu.memory_space<vmem>>, %arg8: memref<16x128xbf16, #tpu.memory_space<vmem>>, %arg9: memref<16x128xf32, #tpu.memory_space<vmem>>) attributes {dimension_semantics = [#tpu.dimension_semantics<parallel>, #tpu.dimension_semantics<arbitrary>], iteration_bounds = array<i64: 1, 1>, scalar_prefetch = 0 : i64, scratch_operands = 1 : i64, tpu.core_type = #tpu.core_type<tc>, window_params = [{transform_indices = @transform_0, window_bounds = array<i64: 16, 128>}, {transform_indices = @transform_1, window_bounds = array<i64: 128, 128>}, {pipeline_mode = #tpu.pipeline_mode<synchronous>, transform_indices = @transform_2, window_bounds = array<i64: 1, 128>}, {transform_indices = @transform_3, window_bounds = array<i64: 16, 128>}, {pipeline_mode = #tpu.pipeline_mode<synchronous>, transform_indices = @transform_4, window_bounds = array<i64: 1, 128>}, {pipeline_mode = #tpu.pipeline_mode<synchronous>, transform_indices = @transform_5, window_bounds = array<i64: 1, 128>}, {transform_indices = @transform_6, window_bounds = array<i64: 16, 128>}]} {
    %c0_i32 = arith.constant 0 : i32
    %0 = arith.cmpi eq, %arg1, %c0_i32 : i32
    %1 = arith.extui %0 : i1 to i32
    %c0_i32_0 = arith.constant 0 : i32
    %2 = arith.cmpi ne, %1, %c0_i32_0 : i32
    scf.if %2 {
      %cst_10 = arith.constant 0.000000e+00 : f32
      %12 = vector.broadcast %cst_10 : f32 to vector<16x128xf32>
      %c0_11 = arith.constant 0 : index
      %c0_12 = arith.constant 0 : index
      %13 = vector.load %arg9[%c0_11, %c0_12] : memref<16x128xf32, #tpu.memory_space<vmem>>, vector<16x128xf32>
      tpu.vector_store %arg9[%c0_11, %c0_12], %12 {strides = array<i32>} : memref<16x128xf32, #tpu.memory_space<vmem>>, vector<16x128xf32>,
    } else {
    }
    %c0 = arith.constant 0 : index
    %c0_1 = arith.constant 0 : index
    %3 = vector.load %arg9[%c0, %c0_1] : memref<16x128xf32, #tpu.memory_space<vmem>>, vector<16x128xf32>
    %c0_2 = arith.constant 0 : index
    %c0_3 = arith.constant 0 : index
    %4 = vector.load %arg2[%c0_2, %c0_3] : memref<16x128xbf16, #tpu.memory_space<vmem>>, vector<16x128xbf16>
    %c0_4 = arith.constant 0 : index
    %c0_5 = arith.constant 0 : index
    %5 = vector.load %arg3[%c0_4, %c0_5] : memref<128x128xbf16, #tpu.memory_space<vmem>>, vector<128x128xbf16>
    %cst = arith.constant dense<0.000000e+00> : vector<16x128xf32>
    %6 = tpu.matmul %4, %5, %cst {dimension_numbers = #tpu.dot_dimension_numbers<[1], [0], [0], [1], [0, 0, 1, 1], [], []>} : vector<16x128xbf16>, vector<128x128xbf16>, vector<16x128xf32> -> vector<16x128xf32>
    %7 = arith.addf %3, %6 : vector<16x128xf32>
    %c0_6 = arith.constant 0 : index
    %c0_7 = arith.constant 0 : index
    %8 = vector.load %arg9[%c0_6, %c0_7] : memref<16x128xf32, #tpu.memory_space<vmem>>, vector<16x128xf32>
    tpu.vector_store %arg9[%c0_6, %c0_7], %7 {strides = array<i32>} : memref<16x128xf32, #tpu.memory_space<vmem>>, vector<16x128xf32>,
    %c0_i32_8 = arith.constant 0 : i32
    %9 = arith.cmpi eq, %arg1, %c0_i32_8 : i32
    %10 = arith.extui %9 : i1 to i32
    %c0_i32_9 = arith.constant 0 : i32
    %11 = arith.cmpi ne, %10, %c0_i32_9 : i32
    scf.if %11 {
      %c0_10 = arith.constant 0 : index
      %c0_11 = arith.constant 0 : index
      %12 = vector.load %arg9[%c0_10, %c0_11] : memref<16x128xf32, #tpu.memory_space<vmem>>, vector<16x128xf32>
      %c0_12 = arith.constant 0 : index
      %c0_13 = arith.constant 0 : index
      %13 = vector.load %arg4[%c0_12, %c0_13] : memref<1x128xf32, #tpu.memory_space<vmem>>, vector<1x128xf32>
      %14 = vector.broadcast %13 : vector<1x128xf32> to vector<16x128xf32>
      %15 = arith.addf %12, %14 : vector<16x128xf32>
      %c0_14 = arith.constant 0 : index
      %c0_15 = arith.constant 0 : index
      %16 = vector.load %arg5[%c0_14, %c0_15] : memref<16x128xbf16, #tpu.memory_space<vmem>>, vector<16x128xbf16>
      %17 = arith.extf %16 : vector<16x128xbf16> to vector<16x128xf32>
      %18 = arith.addf %15, %17 : vector<16x128xf32>
      %cst_16 = arith.constant dense<0.000000e+00> : vector<16xf32>
      %19 = vector.multi_reduction <add>, %18, %cst_16 [1] : vector<16x128xf32> to vector<16xf32>
      %20 = vector.shape_cast %19 : vector<16xf32> to vector<16x1xf32>
      %cst_17 = arith.constant 1.280000e+02 : f32
      %21 = vector.broadcast %cst_17 : f32 to vector<16x1xf32>
      %22 = arith.divf %20, %21 : vector<16x1xf32>
      %23 = vector.broadcast %22 : vector<16x1xf32> to vector<16x128xf32>
      %24 = arith.subf %18, %23 : vector<16x128xf32>
      %25 = arith.mulf %24, %24 : vector<16x128xf32>
      %cst_18 = arith.constant dense<0.000000e+00> : vector<16xf32>
      %26 = vector.multi_reduction <add>, %25, %cst_18 [1] : vector<16x128xf32> to vector<16xf32>
      %27 = vector.shape_cast %26 : vector<16xf32> to vector<16x1xf32>
      %cst_19 = arith.constant 1.280000e+02 : f32
      %28 = vector.broadcast %cst_19 : f32 to vector<16x1xf32>
      %29 = arith.divf %27, %28 : vector<16x1xf32>
      %cst_20 = arith.constant 9.99999996E-13 : f32
      %30 = vector.broadcast %cst_20 : f32 to vector<16x1xf32>
      %31 = arith.addf %29, %30 : vector<16x1xf32>
      %32 = math.rsqrt %31 : vector<16x1xf32>
      %33 = vector.broadcast %32 : vector<16x1xf32> to vector<16x128xf32>
      %34 = arith.mulf %24, %33 : vector<16x128xf32>
      %c0_21 = arith.constant 0 : index
      %c0_22 = arith.constant 0 : index
      %35 = vector.load %arg6[%c0_21, %c0_22] : memref<1x128xf32, #tpu.memory_space<vmem>>, vector<1x128xf32>
      %36 = vector.broadcast %35 : vector<1x128xf32> to vector<16x128xf32>
      %37 = arith.mulf %34, %36 : vector<16x128xf32>
      %c0_23 = arith.constant 0 : index
      %c0_24 = arith.constant 0 : index
      %38 = vector.load %arg7[%c0_23, %c0_24] : memref<1x128xf32, #tpu.memory_space<vmem>>, vector<1x128xf32>
      %39 = vector.broadcast %38 : vector<1x128xf32> to vector<16x128xf32>
      %40 = arith.addf %37, %39 : vector<16x128xf32>
      %41 = arith.truncf %40 : vector<16x128xf32> to vector<16x128xbf16>
      %c0_25 = arith.constant 0 : index
      %c0_26 = arith.constant 0 : index
      %42 = vector.load %arg8[%c0_25, %c0_26] : memref<16x128xbf16, #tpu.memory_space<vmem>>, vector<16x128xbf16>
      tpu.vector_store %arg8[%c0_25, %c0_26], %41 {strides = array<i32>} : memref<16x128xbf16, #tpu.memory_space<vmem>>, vector<16x128xbf16>,
    } else {
    }
    return
  }
  func.func @transform_0(%arg0: i32, %arg1: i32) -> (i32, i32) {
    %c0_i32 = arith.constant 0 : i32
    return %arg0, %arg1 : i32, i32
  }
  func.func @transform_1(%arg0: i32, %arg1: i32) -> (i32, i32) {
    %c0_i32 = arith.constant 0 : i32
    %c0_i32_0 = arith.constant 0 : i32
    return %arg1, %c0_i32 : i32, i32
  }
  func.func @transform_2(%arg0: i32, %arg1: i32) -> (i32, i32) {
    %c0_i32 = arith.constant 0 : i32
    %c0_i32_0 = arith.constant 0 : i32
    %c0_i32_1 = arith.constant 0 : i32
    return %c0_i32, %c0_i32_0 : i32, i32
  }
  func.func @transform_3(%arg0: i32, %arg1: i32) -> (i32, i32) {
    %c0_i32 = arith.constant 0 : i32
    %c0_i32_0 = arith.constant 0 : i32
    return %arg0, %c0_i32 : i32, i32
  }
  func.func @transform_4(%arg0: i32, %arg1: i32) -> (i32, i32) {
    %c0_i32 = arith.constant 0 : i32
    %c0_i32_0 = arith.constant 0 : i32
    %c0_i32_1 = arith.constant 0 : i32
    return %c0_i32, %c0_i32_0 : i32, i32
  }
  func.func @transform_5(%arg0: i32, %arg1: i32) -> (i32, i32) {
    %c0_i32 = arith.constant 0 : i32
    %c0_i32_0 = arith.constant 0 : i32
    %c0_i32_1 = arith.constant 0 : i32
    return %c0_i32, %c0_i32_0 : i32, i32
  }
  func.func @transform_6(%arg0: i32, %arg1: i32) -> (i32, i32) {
    %c0_i32 = arith.constant 0 : i32
    %c0_i32_0 = arith.constant 0 : i32
    return %arg0, %c0_i32 : i32, i32
  }
}

module attributes {stable_mosaic.version = 11 : i64} {
  func.func @_qkv_attn_kernel(%arg0: i32, %arg1: i32, %arg2: memref<1x1x8xf32, #tpu.memory_space<vmem>>, %arg3: memref<8x128xbf16, #tpu.memory_space<vmem>>, %arg4: memref<128x128xbf16, #tpu.memory_space<vmem>>, %arg5: memref<128x128xbf16, #tpu.memory_space<vmem>>, %arg6: memref<128x128xbf16, #tpu.memory_space<vmem>>, %arg7: memref<1x128xf32, #tpu.memory_space<vmem>>, %arg8: memref<1x128xf32, #tpu.memory_space<vmem>>, %arg9: memref<1x128xf32, #tpu.memory_space<vmem>>, %arg10: memref<8x128xbf16, #tpu.memory_space<vmem>>) attributes {dimension_semantics = [#tpu.dimension_semantics<parallel>, #tpu.dimension_semantics<parallel>], iteration_bounds = array<i64: 2, 1>, scalar_prefetch = 0 : i64, scratch_operands = 0 : i64, tpu.core_type = #tpu.core_type<tc>, window_params = [{transform_indices = @transform_0, window_bounds = array<i64: 1, 1, 8>}, {transform_indices = @transform_1, window_bounds = array<i64: 8, 128>}, {transform_indices = @transform_2, window_bounds = array<i64: 128, 128>}, {transform_indices = @transform_3, window_bounds = array<i64: 128, 128>}, {transform_indices = @transform_4, window_bounds = array<i64: 128, 128>}, {transform_indices = @transform_5, window_bounds = array<i64: 1, 128>}, {transform_indices = @transform_6, window_bounds = array<i64: 1, 128>}, {transform_indices = @transform_7, window_bounds = array<i64: 1, 128>}, {transform_indices = @transform_8, window_bounds = array<i64: 8, 128>}]} {
    %c0 = arith.constant 0 : index
    %c0_0 = arith.constant 0 : index
    %0 = vector.load %arg3[%c0, %c0_0] : memref<8x128xbf16, #tpu.memory_space<vmem>>, vector<8x128xbf16>
    %c0_1 = arith.constant 0 : index
    %c0_2 = arith.constant 0 : index
    %c0_3 = arith.constant 0 : index
    %1 = vector.load %arg2[%c0_1, %c0_2, %c0_3] : memref<1x1x8xf32, #tpu.memory_space<vmem>>, vector<1x1x8xf32>
    %2 = vector.shape_cast %1 : vector<1x1x8xf32> to vector<1x8xf32>
    %cst = arith.constant 1.000000e+00 : f32
    %3 = vector.broadcast %cst : f32 to vector<1x8xf32>
    %4 = arith.subf %3, %2 : vector<1x8xf32>
    %cst_4 = arith.constant -1.000000e+09 : f32
    %5 = vector.broadcast %cst_4 : f32 to vector<1x8xf32>
    %6 = arith.mulf %4, %5 : vector<1x8xf32>
    %c0_5 = arith.constant 0 : index
    %c0_6 = arith.constant 0 : index
    %7 = vector.load %arg4[%c0_5, %c0_6] : memref<128x128xbf16, #tpu.memory_space<vmem>>, vector<128x128xbf16>
    %cst_7 = arith.constant dense<0.000000e+00> : vector<8x128xf32>
    %8 = tpu.matmul %0, %7, %cst_7 {dimension_numbers = #tpu.dot_dimension_numbers<[1], [0], [0], [1], [0, 0, 1, 1], [], []>} : vector<8x128xbf16>, vector<128x128xbf16>, vector<8x128xf32> -> vector<8x128xf32>
    %c0_8 = arith.constant 0 : index
    %c0_9 = arith.constant 0 : index
    %9 = vector.load %arg7[%c0_8, %c0_9] : memref<1x128xf32, #tpu.memory_space<vmem>>, vector<1x128xf32>
    %10 = vector.broadcast %9 : vector<1x128xf32> to vector<8x128xf32>
    %11 = arith.addf %8, %10 : vector<8x128xf32>
    %12 = arith.truncf %11 : vector<8x128xf32> to vector<8x128xbf16>
    %c0_10 = arith.constant 0 : index
    %c0_11 = arith.constant 0 : index
    %13 = vector.load %arg5[%c0_10, %c0_11] : memref<128x128xbf16, #tpu.memory_space<vmem>>, vector<128x128xbf16>
    %cst_12 = arith.constant dense<0.000000e+00> : vector<8x128xf32>
    %14 = tpu.matmul %0, %13, %cst_12 {dimension_numbers = #tpu.dot_dimension_numbers<[1], [0], [0], [1], [0, 0, 1, 1], [], []>} : vector<8x128xbf16>, vector<128x128xbf16>, vector<8x128xf32> -> vector<8x128xf32>
    %c0_13 = arith.constant 0 : index
    %c0_14 = arith.constant 0 : index
    %15 = vector.load %arg8[%c0_13, %c0_14] : memref<1x128xf32, #tpu.memory_space<vmem>>, vector<1x128xf32>
    %16 = vector.broadcast %15 : vector<1x128xf32> to vector<8x128xf32>
    %17 = arith.addf %14, %16 : vector<8x128xf32>
    %18 = arith.truncf %17 : vector<8x128xf32> to vector<8x128xbf16>
    %c0_15 = arith.constant 0 : index
    %c0_16 = arith.constant 0 : index
    %19 = vector.load %arg6[%c0_15, %c0_16] : memref<128x128xbf16, #tpu.memory_space<vmem>>, vector<128x128xbf16>
    %cst_17 = arith.constant dense<0.000000e+00> : vector<8x128xf32>
    %20 = tpu.matmul %0, %19, %cst_17 {dimension_numbers = #tpu.dot_dimension_numbers<[1], [0], [0], [1], [0, 0, 1, 1], [], []>} : vector<8x128xbf16>, vector<128x128xbf16>, vector<8x128xf32> -> vector<8x128xf32>
    %c0_18 = arith.constant 0 : index
    %c0_19 = arith.constant 0 : index
    %21 = vector.load %arg9[%c0_18, %c0_19] : memref<1x128xf32, #tpu.memory_space<vmem>>, vector<1x128xf32>
    %22 = vector.broadcast %21 : vector<1x128xf32> to vector<8x128xf32>
    %23 = arith.addf %20, %22 : vector<8x128xf32>
    %24 = arith.truncf %23 : vector<8x128xf32> to vector<8x128xbf16>
    %25 = vector.extract_strided_slice %12 {offsets = [0, 0], sizes = [8, 64], strides = [1, 1]} : vector<8x128xbf16> to vector<8x64xbf16>
    %26 = vector.extract_strided_slice %18 {offsets = [0, 0], sizes = [8, 64], strides = [1, 1]} : vector<8x128xbf16> to vector<8x64xbf16>
    %27 = vector.extract_strided_slice %24 {offsets = [0, 0], sizes = [8, 64], strides = [1, 1]} : vector<8x128xbf16> to vector<8x64xbf16>
    %cst_20 = arith.constant dense<0.000000e+00> : vector<8x8xf32>
    %28 = tpu.matmul %25, %26, %cst_20 {dimension_numbers = #tpu.dot_dimension_numbers<[1], [1], [0], [0], [0, 0, 1, 0], [], []>} : vector<8x64xbf16>, vector<8x64xbf16>, vector<8x8xf32> -> vector<8x8xf32>
    %cst_21 = arith.constant 1.250000e-01 : f32
    %29 = vector.broadcast %cst_21 : f32 to vector<8x8xf32>
    %30 = arith.mulf %28, %29 : vector<8x8xf32>
    %31 = vector.broadcast %6 : vector<1x8xf32> to vector<8x8xf32>
    %32 = arith.addf %30, %31 : vector<8x8xf32>
    %cst_22 = arith.constant dense<0xFF800000> : vector<8xf32>
    %33 = vector.multi_reduction <maximumf>, %32, %cst_22 [1] : vector<8x8xf32> to vector<8xf32>
    %34 = vector.shape_cast %33 : vector<8xf32> to vector<8x1xf32>
    %35 = vector.broadcast %34 : vector<8x1xf32> to vector<8x8xf32>
    %36 = arith.subf %32, %35 : vector<8x8xf32>
    %37 = math.exp %36 : vector<8x8xf32>
    %cst_23 = arith.constant dense<0.000000e+00> : vector<8xf32>
    %38 = vector.multi_reduction <add>, %37, %cst_23 [1] : vector<8x8xf32> to vector<8xf32>
    %39 = vector.shape_cast %38 : vector<8xf32> to vector<8x1xf32>
    %40 = tpu.reciprocal %39 {approx = true} : vector<8x1xf32> -> vector<8x1xf32>
    %41 = vector.broadcast %40 : vector<8x1xf32> to vector<8x8xf32>
    %42 = arith.mulf %37, %41 : vector<8x8xf32>
    %43 = arith.truncf %42 : vector<8x8xf32> to vector<8x8xbf16>
    %cst_24 = arith.constant dense<0.000000e+00> : vector<8x64xf32>
    %44 = tpu.matmul %43, %27, %cst_24 {dimension_numbers = #tpu.dot_dimension_numbers<[1], [0], [0], [1], [0, 0, 1, 1], [], []>} : vector<8x8xbf16>, vector<8x64xbf16>, vector<8x64xf32> -> vector<8x64xf32>
    %45 = vector.extract_strided_slice %12 {offsets = [0, 64], sizes = [8, 64], strides = [1, 1]} : vector<8x128xbf16> to vector<8x64xbf16>
    %46 = vector.extract_strided_slice %18 {offsets = [0, 64], sizes = [8, 64], strides = [1, 1]} : vector<8x128xbf16> to vector<8x64xbf16>
    %47 = vector.extract_strided_slice %24 {offsets = [0, 64], sizes = [8, 64], strides = [1, 1]} : vector<8x128xbf16> to vector<8x64xbf16>
    %cst_25 = arith.constant dense<0.000000e+00> : vector<8x8xf32>
    %48 = tpu.matmul %45, %46, %cst_25 {dimension_numbers = #tpu.dot_dimension_numbers<[1], [1], [0], [0], [0, 0, 1, 0], [], []>} : vector<8x64xbf16>, vector<8x64xbf16>, vector<8x8xf32> -> vector<8x8xf32>
    %cst_26 = arith.constant 1.250000e-01 : f32
    %49 = vector.broadcast %cst_26 : f32 to vector<8x8xf32>
    %50 = arith.mulf %48, %49 : vector<8x8xf32>
    %51 = vector.broadcast %6 : vector<1x8xf32> to vector<8x8xf32>
    %52 = arith.addf %50, %51 : vector<8x8xf32>
    %cst_27 = arith.constant dense<0xFF800000> : vector<8xf32>
    %53 = vector.multi_reduction <maximumf>, %52, %cst_27 [1] : vector<8x8xf32> to vector<8xf32>
    %54 = vector.shape_cast %53 : vector<8xf32> to vector<8x1xf32>
    %55 = vector.broadcast %54 : vector<8x1xf32> to vector<8x8xf32>
    %56 = arith.subf %52, %55 : vector<8x8xf32>
    %57 = math.exp %56 : vector<8x8xf32>
    %cst_28 = arith.constant dense<0.000000e+00> : vector<8xf32>
    %58 = vector.multi_reduction <add>, %57, %cst_28 [1] : vector<8x8xf32> to vector<8xf32>
    %59 = vector.shape_cast %58 : vector<8xf32> to vector<8x1xf32>
    %60 = tpu.reciprocal %59 {approx = true} : vector<8x1xf32> -> vector<8x1xf32>
    %61 = vector.broadcast %60 : vector<8x1xf32> to vector<8x8xf32>
    %62 = arith.mulf %57, %61 : vector<8x8xf32>
    %63 = arith.truncf %62 : vector<8x8xf32> to vector<8x8xbf16>
    %cst_29 = arith.constant dense<0.000000e+00> : vector<8x64xf32>
    %64 = tpu.matmul %63, %47, %cst_29 {dimension_numbers = #tpu.dot_dimension_numbers<[1], [0], [0], [1], [0, 0, 1, 1], [], []>} : vector<8x8xbf16>, vector<8x64xbf16>, vector<8x64xf32> -> vector<8x64xf32>
    %65 = tpu.concatenate %44, %64 in 1 : vector<8x64xf32>, vector<8x64xf32> -> vector<8x128xf32>
    %66 = arith.truncf %65 : vector<8x128xf32> to vector<8x128xbf16>
    %c0_30 = arith.constant 0 : index
    %c0_31 = arith.constant 0 : index
    %67 = vector.load %arg10[%c0_30, %c0_31] : memref<8x128xbf16, #tpu.memory_space<vmem>>, vector<8x128xbf16>
    tpu.vector_store %arg10[%c0_30, %c0_31], %66 {strides = array<i32>} : memref<8x128xbf16, #tpu.memory_space<vmem>>, vector<8x128xbf16>,
    return
  }
  func.func @transform_0(%arg0: i32, %arg1: i32) -> (i32, i32, i32) {
    %c0_i32 = arith.constant 0 : i32
    %c0_i32_0 = arith.constant 0 : i32
    %c0_i32_1 = arith.constant 0 : i32
    return %arg0, %c0_i32, %c0_i32_0 : i32, i32, i32
  }
  func.func @transform_1(%arg0: i32, %arg1: i32) -> (i32, i32) {
    %c0_i32 = arith.constant 0 : i32
    %c0_i32_0 = arith.constant 0 : i32
    return %arg0, %c0_i32 : i32, i32
  }
  func.func @transform_2(%arg0: i32, %arg1: i32) -> (i32, i32) {
    %c0_i32 = arith.constant 0 : i32
    %c0_i32_0 = arith.constant 0 : i32
    return %c0_i32, %arg1 : i32, i32
  }
  func.func @transform_3(%arg0: i32, %arg1: i32) -> (i32, i32) {
    %c0_i32 = arith.constant 0 : i32
    %c0_i32_0 = arith.constant 0 : i32
    return %c0_i32, %arg1 : i32, i32
  }
  func.func @transform_4(%arg0: i32, %arg1: i32) -> (i32, i32) {
    %c0_i32 = arith.constant 0 : i32
    %c0_i32_0 = arith.constant 0 : i32
    return %c0_i32, %arg1 : i32, i32
  }
  func.func @transform_5(%arg0: i32, %arg1: i32) -> (i32, i32) {
    %c0_i32 = arith.constant 0 : i32
    %c0_i32_0 = arith.constant 0 : i32
    return %c0_i32, %arg1 : i32, i32
  }
  func.func @transform_6(%arg0: i32, %arg1: i32) -> (i32, i32) {
    %c0_i32 = arith.constant 0 : i32
    %c0_i32_0 = arith.constant 0 : i32
    return %c0_i32, %arg1 : i32, i32
  }
  func.func @transform_7(%arg0: i32, %arg1: i32) -> (i32, i32) {
    %c0_i32 = arith.constant 0 : i32
    %c0_i32_0 = arith.constant 0 : i32
    return %c0_i32, %arg1 : i32, i32
  }
  func.func @transform_8(%arg0: i32, %arg1: i32) -> (i32, i32) {
    %c0_i32 = arith.constant 0 : i32
    return %arg0, %arg1 : i32, i32
  }
}

module attributes {stable_mosaic.version = 11 : i64} {
  func.func @_linear_kernel(%arg0: i32, %arg1: i32, %arg2: i32, %arg3: memref<16x128xbf16, #tpu.memory_space<vmem>>, %arg4: memref<128x256xbf16, #tpu.memory_space<vmem>>, %arg5: memref<1x256xf32, #tpu.memory_space<vmem>>, %arg6: memref<16x256xbf16, #tpu.memory_space<vmem>>, %arg7: memref<16x256xf32, #tpu.memory_space<vmem>>) attributes {dimension_semantics = [#tpu.dimension_semantics<parallel>, #tpu.dimension_semantics<parallel>, #tpu.dimension_semantics<arbitrary>], iteration_bounds = array<i64: 1, 1, 1>, scalar_prefetch = 0 : i64, scratch_operands = 1 : i64, tpu.core_type = #tpu.core_type<tc>, window_params = [{transform_indices = @transform_0, window_bounds = array<i64: 16, 128>}, {transform_indices = @transform_1, window_bounds = array<i64: 128, 256>}, {transform_indices = @transform_2, window_bounds = array<i64: 1, 256>}, {transform_indices = @transform_3, window_bounds = array<i64: 16, 256>}]} {
    %c0_i32 = arith.constant 0 : i32
    %0 = arith.cmpi eq, %arg2, %c0_i32 : i32
    %1 = arith.extui %0 : i1 to i32
    %c0_i32_0 = arith.constant 0 : i32
    %2 = arith.cmpi ne, %1, %c0_i32_0 : i32
    scf.if %2 {
      %cst_10 = arith.constant 0.000000e+00 : f32
      %12 = vector.broadcast %cst_10 : f32 to vector<16x256xf32>
      %c0_11 = arith.constant 0 : index
      %c0_12 = arith.constant 0 : index
      %13 = vector.load %arg7[%c0_11, %c0_12] : memref<16x256xf32, #tpu.memory_space<vmem>>, vector<16x256xf32>
      tpu.vector_store %arg7[%c0_11, %c0_12], %12 {strides = array<i32>} : memref<16x256xf32, #tpu.memory_space<vmem>>, vector<16x256xf32>,
    } else {
    }
    %c0 = arith.constant 0 : index
    %c0_1 = arith.constant 0 : index
    %3 = vector.load %arg7[%c0, %c0_1] : memref<16x256xf32, #tpu.memory_space<vmem>>, vector<16x256xf32>
    %c0_2 = arith.constant 0 : index
    %c0_3 = arith.constant 0 : index
    %4 = vector.load %arg3[%c0_2, %c0_3] : memref<16x128xbf16, #tpu.memory_space<vmem>>, vector<16x128xbf16>
    %c0_4 = arith.constant 0 : index
    %c0_5 = arith.constant 0 : index
    %5 = vector.load %arg4[%c0_4, %c0_5] : memref<128x256xbf16, #tpu.memory_space<vmem>>, vector<128x256xbf16>
    %cst = arith.constant dense<0.000000e+00> : vector<16x256xf32>
    %6 = tpu.matmul %4, %5, %cst {dimension_numbers = #tpu.dot_dimension_numbers<[1], [0], [0], [1], [0, 0, 1, 1], [], []>} : vector<16x128xbf16>, vector<128x256xbf16>, vector<16x256xf32> -> vector<16x256xf32>
    %7 = arith.addf %3, %6 : vector<16x256xf32>
    %c0_6 = arith.constant 0 : index
    %c0_7 = arith.constant 0 : index
    %8 = vector.load %arg7[%c0_6, %c0_7] : memref<16x256xf32, #tpu.memory_space<vmem>>, vector<16x256xf32>
    tpu.vector_store %arg7[%c0_6, %c0_7], %7 {strides = array<i32>} : memref<16x256xf32, #tpu.memory_space<vmem>>, vector<16x256xf32>,
    %c0_i32_8 = arith.constant 0 : i32
    %9 = arith.cmpi eq, %arg2, %c0_i32_8 : i32
    %10 = arith.extui %9 : i1 to i32
    %c0_i32_9 = arith.constant 0 : i32
    %11 = arith.cmpi ne, %10, %c0_i32_9 : i32
    scf.if %11 {
      %c0_10 = arith.constant 0 : index
      %c0_11 = arith.constant 0 : index
      %12 = vector.load %arg7[%c0_10, %c0_11] : memref<16x256xf32, #tpu.memory_space<vmem>>, vector<16x256xf32>
      %c0_12 = arith.constant 0 : index
      %c0_13 = arith.constant 0 : index
      %13 = vector.load %arg5[%c0_12, %c0_13] : memref<1x256xf32, #tpu.memory_space<vmem>>, vector<1x256xf32>
      %14 = vector.broadcast %13 : vector<1x256xf32> to vector<16x256xf32>
      %15 = arith.addf %12, %14 : vector<16x256xf32>
      %16 = arith.mulf %15, %15 : vector<16x256xf32>
      %17 = arith.mulf %15, %16 : vector<16x256xf32>
      %cst_14 = arith.constant 4.471500e-02 : f32
      %18 = vector.broadcast %cst_14 : f32 to vector<16x256xf32>
      %19 = arith.mulf %18, %17 : vector<16x256xf32>
      %20 = arith.addf %15, %19 : vector<16x256xf32>
      %cst_15 = arith.constant 0.797884583 : f32
      %21 = vector.broadcast %cst_15 : f32 to vector<16x256xf32>
      %22 = arith.mulf %21, %20 : vector<16x256xf32>
      %23 = math.tanh %22 : vector<16x256xf32>
      %cst_16 = arith.constant 1.000000e+00 : f32
      %24 = vector.broadcast %cst_16 : f32 to vector<16x256xf32>
      %25 = arith.addf %24, %23 : vector<16x256xf32>
      %cst_17 = arith.constant 5.000000e-01 : f32
      %26 = vector.broadcast %cst_17 : f32 to vector<16x256xf32>
      %27 = arith.mulf %26, %25 : vector<16x256xf32>
      %28 = arith.mulf %15, %27 : vector<16x256xf32>
      %29 = arith.truncf %28 : vector<16x256xf32> to vector<16x256xbf16>
      %c0_18 = arith.constant 0 : index
      %c0_19 = arith.constant 0 : index
      %30 = vector.load %arg6[%c0_18, %c0_19] : memref<16x256xbf16, #tpu.memory_space<vmem>>, vector<16x256xbf16>
      tpu.vector_store %arg6[%c0_18, %c0_19], %29 {strides = array<i32>} : memref<16x256xbf16, #tpu.memory_space<vmem>>, vector<16x256xbf16>,
    } else {
    }
    return
  }
  func.func @transform_0(%arg0: i32, %arg1: i32, %arg2: i32) -> (i32, i32) {
    %c0_i32 = arith.constant 0 : i32
    return %arg0, %arg2 : i32, i32
  }
  func.func @transform_1(%arg0: i32, %arg1: i32, %arg2: i32) -> (i32, i32) {
    %c0_i32 = arith.constant 0 : i32
    return %arg2, %arg1 : i32, i32
  }
  func.func @transform_2(%arg0: i32, %arg1: i32, %arg2: i32) -> (i32, i32) {
    %c0_i32 = arith.constant 0 : i32
    %c0_i32_0 = arith.constant 0 : i32
    return %c0_i32, %arg1 : i32, i32
  }
  func.func @transform_3(%arg0: i32, %arg1: i32, %arg2: i32) -> (i32, i32) {
    %c0_i32 = arith.constant 0 : i32
    return %arg0, %arg1 : i32, i32
  }
}

module attributes {stable_mosaic.version = 11 : i64} {
  func.func @_linear_res_ln_kernel(%arg0: i32, %arg1: i32, %arg2: memref<16x256xbf16, #tpu.memory_space<vmem>>, %arg3: memref<256x128xbf16, #tpu.memory_space<vmem>>, %arg4: memref<1x128xf32, #tpu.memory_space<vmem>>, %arg5: memref<16x128xbf16, #tpu.memory_space<vmem>>, %arg6: memref<1x128xf32, #tpu.memory_space<vmem>>, %arg7: memref<1x128xf32, #tpu.memory_space<vmem>>, %arg8: memref<16x128xbf16, #tpu.memory_space<vmem>>, %arg9: memref<16x128xf32, #tpu.memory_space<vmem>>) attributes {dimension_semantics = [#tpu.dimension_semantics<parallel>, #tpu.dimension_semantics<arbitrary>], iteration_bounds = array<i64: 1, 1>, scalar_prefetch = 0 : i64, scratch_operands = 1 : i64, tpu.core_type = #tpu.core_type<tc>, window_params = [{transform_indices = @transform_0, window_bounds = array<i64: 16, 256>}, {transform_indices = @transform_1, window_bounds = array<i64: 256, 128>}, {pipeline_mode = #tpu.pipeline_mode<synchronous>, transform_indices = @transform_2, window_bounds = array<i64: 1, 128>}, {transform_indices = @transform_3, window_bounds = array<i64: 16, 128>}, {pipeline_mode = #tpu.pipeline_mode<synchronous>, transform_indices = @transform_4, window_bounds = array<i64: 1, 128>}, {pipeline_mode = #tpu.pipeline_mode<synchronous>, transform_indices = @transform_5, window_bounds = array<i64: 1, 128>}, {transform_indices = @transform_6, window_bounds = array<i64: 16, 128>}]} {
    %c0_i32 = arith.constant 0 : i32
    %0 = arith.cmpi eq, %arg1, %c0_i32 : i32
    %1 = arith.extui %0 : i1 to i32
    %c0_i32_0 = arith.constant 0 : i32
    %2 = arith.cmpi ne, %1, %c0_i32_0 : i32
    scf.if %2 {
      %cst_10 = arith.constant 0.000000e+00 : f32
      %12 = vector.broadcast %cst_10 : f32 to vector<16x128xf32>
      %c0_11 = arith.constant 0 : index
      %c0_12 = arith.constant 0 : index
      %13 = vector.load %arg9[%c0_11, %c0_12] : memref<16x128xf32, #tpu.memory_space<vmem>>, vector<16x128xf32>
      tpu.vector_store %arg9[%c0_11, %c0_12], %12 {strides = array<i32>} : memref<16x128xf32, #tpu.memory_space<vmem>>, vector<16x128xf32>,
    } else {
    }
    %c0 = arith.constant 0 : index
    %c0_1 = arith.constant 0 : index
    %3 = vector.load %arg9[%c0, %c0_1] : memref<16x128xf32, #tpu.memory_space<vmem>>, vector<16x128xf32>
    %c0_2 = arith.constant 0 : index
    %c0_3 = arith.constant 0 : index
    %4 = vector.load %arg2[%c0_2, %c0_3] : memref<16x256xbf16, #tpu.memory_space<vmem>>, vector<16x256xbf16>
    %c0_4 = arith.constant 0 : index
    %c0_5 = arith.constant 0 : index
    %5 = vector.load %arg3[%c0_4, %c0_5] : memref<256x128xbf16, #tpu.memory_space<vmem>>, vector<256x128xbf16>
    %cst = arith.constant dense<0.000000e+00> : vector<16x128xf32>
    %6 = tpu.matmul %4, %5, %cst {dimension_numbers = #tpu.dot_dimension_numbers<[1], [0], [0], [1], [0, 0, 1, 1], [], []>} : vector<16x256xbf16>, vector<256x128xbf16>, vector<16x128xf32> -> vector<16x128xf32>
    %7 = arith.addf %3, %6 : vector<16x128xf32>
    %c0_6 = arith.constant 0 : index
    %c0_7 = arith.constant 0 : index
    %8 = vector.load %arg9[%c0_6, %c0_7] : memref<16x128xf32, #tpu.memory_space<vmem>>, vector<16x128xf32>
    tpu.vector_store %arg9[%c0_6, %c0_7], %7 {strides = array<i32>} : memref<16x128xf32, #tpu.memory_space<vmem>>, vector<16x128xf32>,
    %c0_i32_8 = arith.constant 0 : i32
    %9 = arith.cmpi eq, %arg1, %c0_i32_8 : i32
    %10 = arith.extui %9 : i1 to i32
    %c0_i32_9 = arith.constant 0 : i32
    %11 = arith.cmpi ne, %10, %c0_i32_9 : i32
    scf.if %11 {
      %c0_10 = arith.constant 0 : index
      %c0_11 = arith.constant 0 : index
      %12 = vector.load %arg9[%c0_10, %c0_11] : memref<16x128xf32, #tpu.memory_space<vmem>>, vector<16x128xf32>
      %c0_12 = arith.constant 0 : index
      %c0_13 = arith.constant 0 : index
      %13 = vector.load %arg4[%c0_12, %c0_13] : memref<1x128xf32, #tpu.memory_space<vmem>>, vector<1x128xf32>
      %14 = vector.broadcast %13 : vector<1x128xf32> to vector<16x128xf32>
      %15 = arith.addf %12, %14 : vector<16x128xf32>
      %c0_14 = arith.constant 0 : index
      %c0_15 = arith.constant 0 : index
      %16 = vector.load %arg5[%c0_14, %c0_15] : memref<16x128xbf16, #tpu.memory_space<vmem>>, vector<16x128xbf16>
      %17 = arith.extf %16 : vector<16x128xbf16> to vector<16x128xf32>
      %18 = arith.addf %15, %17 : vector<16x128xf32>
      %cst_16 = arith.constant dense<0.000000e+00> : vector<16xf32>
      %19 = vector.multi_reduction <add>, %18, %cst_16 [1] : vector<16x128xf32> to vector<16xf32>
      %20 = vector.shape_cast %19 : vector<16xf32> to vector<16x1xf32>
      %cst_17 = arith.constant 1.280000e+02 : f32
      %21 = vector.broadcast %cst_17 : f32 to vector<16x1xf32>
      %22 = arith.divf %20, %21 : vector<16x1xf32>
      %23 = vector.broadcast %22 : vector<16x1xf32> to vector<16x128xf32>
      %24 = arith.subf %18, %23 : vector<16x128xf32>
      %25 = arith.mulf %24, %24 : vector<16x128xf32>
      %cst_18 = arith.constant dense<0.000000e+00> : vector<16xf32>
      %26 = vector.multi_reduction <add>, %25, %cst_18 [1] : vector<16x128xf32> to vector<16xf32>
      %27 = vector.shape_cast %26 : vector<16xf32> to vector<16x1xf32>
      %cst_19 = arith.constant 1.280000e+02 : f32
      %28 = vector.broadcast %cst_19 : f32 to vector<16x1xf32>
      %29 = arith.divf %27, %28 : vector<16x1xf32>
      %cst_20 = arith.constant 9.99999996E-13 : f32
      %30 = vector.broadcast %cst_20 : f32 to vector<16x1xf32>
      %31 = arith.addf %29, %30 : vector<16x1xf32>
      %32 = math.rsqrt %31 : vector<16x1xf32>
      %33 = vector.broadcast %32 : vector<16x1xf32> to vector<16x128xf32>
      %34 = arith.mulf %24, %33 : vector<16x128xf32>
      %c0_21 = arith.constant 0 : index
      %c0_22 = arith.constant 0 : index
      %35 = vector.load %arg6[%c0_21, %c0_22] : memref<1x128xf32, #tpu.memory_space<vmem>>, vector<1x128xf32>
      %36 = vector.broadcast %35 : vector<1x128xf32> to vector<16x128xf32>
      %37 = arith.mulf %34, %36 : vector<16x128xf32>
      %c0_23 = arith.constant 0 : index
      %c0_24 = arith.constant 0 : index
      %38 = vector.load %arg7[%c0_23, %c0_24] : memref<1x128xf32, #tpu.memory_space<vmem>>, vector<1x128xf32>
      %39 = vector.broadcast %38 : vector<1x128xf32> to vector<16x128xf32>
      %40 = arith.addf %37, %39 : vector<16x128xf32>
      %41 = arith.truncf %40 : vector<16x128xf32> to vector<16x128xbf16>
      %c0_25 = arith.constant 0 : index
      %c0_26 = arith.constant 0 : index
      %42 = vector.load %arg8[%c0_25, %c0_26] : memref<16x128xbf16, #tpu.memory_space<vmem>>, vector<16x128xbf16>
      tpu.vector_store %arg8[%c0_25, %c0_26], %41 {strides = array<i32>} : memref<16x128xbf16, #tpu.memory_space<vmem>>, vector<16x128xbf16>,
    } else {
    }
    return
  }
  func.func @transform_0(%arg0: i32, %arg1: i32) -> (i32, i32) {
    %c0_i32 = arith.constant 0 : i32
    return %arg0, %arg1 : i32, i32
  }
  func.func @transform_1(%arg0: i32, %arg1: i32) -> (i32, i32) {
    %c0_i32 = arith.constant 0 : i32
    %c0_i32_0 = arith.constant 0 : i32
    return %arg1, %c0_i32 : i32, i32
  }
  func.func @transform_2(%arg0: i32, %arg1: i32) -> (i32, i32) {
    %c0_i32 = arith.constant 0 : i32
    %c0_i32_0 = arith.constant 0 : i32
    %c0_i32_1 = arith.constant 0 : i32
    return %c0_i32, %c0_i32_0 : i32, i32
  }
  func.func @transform_3(%arg0: i32, %arg1: i32) -> (i32, i32) {
    %c0_i32 = arith.constant 0 : i32
    %c0_i32_0 = arith.constant 0 : i32
    return %arg0, %c0_i32 : i32, i32
  }
  func.func @transform_4(%arg0: i32, %arg1: i32) -> (i32, i32) {
    %c0_i32 = arith.constant 0 : i32
    %c0_i32_0 = arith.constant 0 : i32
    %c0_i32_1 = arith.constant 0 : i32
    return %c0_i32, %c0_i32_0 : i32, i32
  }
  func.func @transform_5(%arg0: i32, %arg1: i32) -> (i32, i32) {
    %c0_i32 = arith.constant 0 : i32
    %c0_i32_0 = arith.constant 0 : i32
    %c0_i32_1 = arith.constant 0 : i32
    return %c0_i32, %c0_i32_0 : i32, i32
  }
  func.func @transform_6(%arg0: i32, %arg1: i32) -> (i32, i32) {
    %c0_i32 = arith.constant 0 : i32
    %c0_i32_0 = arith.constant 0 : i32
    return %arg0, %c0_i32 : i32, i32
  }
}

module attributes {stable_mosaic.version = 11 : i64} {
  func.func @_pooler_cls_kernel(%arg0: i32, %arg1: memref<2x128xbf16, #tpu.memory_space<vmem>>, %arg2: memref<128x128xbf16, #tpu.memory_space<vmem>>, %arg3: memref<1x128xf32, #tpu.memory_space<vmem>>, %arg4: memref<128x128xbf16, #tpu.memory_space<vmem>>, %arg5: memref<1x128xf32, #tpu.memory_space<vmem>>, %arg6: memref<2x128xf32, #tpu.memory_space<vmem>>) attributes {dimension_semantics = [#tpu.dimension_semantics<arbitrary>], iteration_bounds = array<i64: 1>, scalar_prefetch = 0 : i64, scratch_operands = 0 : i64, tpu.core_type = #tpu.core_type<tc>, window_params = [{pipeline_mode = #tpu.pipeline_mode<synchronous>, transform_indices = @transform_0, window_bounds = array<i64: 2, 128>}, {pipeline_mode = #tpu.pipeline_mode<synchronous>, transform_indices = @transform_1, window_bounds = array<i64: 128, 128>}, {pipeline_mode = #tpu.pipeline_mode<synchronous>, transform_indices = @transform_2, window_bounds = array<i64: 1, 128>}, {pipeline_mode = #tpu.pipeline_mode<synchronous>, transform_indices = @transform_3, window_bounds = array<i64: 128, 128>}, {pipeline_mode = #tpu.pipeline_mode<synchronous>, transform_indices = @transform_4, window_bounds = array<i64: 1, 128>}, {pipeline_mode = #tpu.pipeline_mode<synchronous>, transform_indices = @transform_5, window_bounds = array<i64: 2, 128>}]} {
    %c0 = arith.constant 0 : index
    %c0_0 = arith.constant 0 : index
    %0 = vector.load %arg1[%c0, %c0_0] : memref<2x128xbf16, #tpu.memory_space<vmem>>, vector<2x128xbf16>
    %c0_1 = arith.constant 0 : index
    %c0_2 = arith.constant 0 : index
    %1 = vector.load %arg2[%c0_1, %c0_2] : memref<128x128xbf16, #tpu.memory_space<vmem>>, vector<128x128xbf16>
    %cst = arith.constant dense<0.000000e+00> : vector<2x128xf32>
    %2 = tpu.matmul %0, %1, %cst {dimension_numbers = #tpu.dot_dimension_numbers<[1], [0], [0], [1], [0, 0, 1, 1], [], []>} : vector<2x128xbf16>, vector<128x128xbf16>, vector<2x128xf32> -> vector<2x128xf32>
    %c0_3 = arith.constant 0 : index
    %c0_4 = arith.constant 0 : index
    %3 = vector.load %arg3[%c0_3, %c0_4] : memref<1x128xf32, #tpu.memory_space<vmem>>, vector<1x128xf32>
    %4 = vector.broadcast %3 : vector<1x128xf32> to vector<2x128xf32>
    %5 = arith.addf %2, %4 : vector<2x128xf32>
    %6 = math.tanh %5 : vector<2x128xf32>
    %7 = arith.truncf %6 : vector<2x128xf32> to vector<2x128xbf16>
    %c0_5 = arith.constant 0 : index
    %c0_6 = arith.constant 0 : index
    %8 = vector.load %arg4[%c0_5, %c0_6] : memref<128x128xbf16, #tpu.memory_space<vmem>>, vector<128x128xbf16>
    %cst_7 = arith.constant dense<0.000000e+00> : vector<2x128xf32>
    %9 = tpu.matmul %7, %8, %cst_7 {dimension_numbers = #tpu.dot_dimension_numbers<[1], [0], [0], [1], [0, 0, 1, 1], [], []>} : vector<2x128xbf16>, vector<128x128xbf16>, vector<2x128xf32> -> vector<2x128xf32>
    %c0_8 = arith.constant 0 : index
    %c0_9 = arith.constant 0 : index
    %10 = vector.load %arg5[%c0_8, %c0_9] : memref<1x128xf32, #tpu.memory_space<vmem>>, vector<1x128xf32>
    %11 = vector.broadcast %10 : vector<1x128xf32> to vector<2x128xf32>
    %12 = arith.addf %9, %11 : vector<2x128xf32>
    %cst_10 = arith.constant 0.000000e+00 : f32
    %13 = vector.broadcast %cst_10 : f32 to vector<2x128xf32>
    %14 = arith.maximumf %12, %13 : vector<2x128xf32>
    %c0_11 = arith.constant 0 : index
    %c0_12 = arith.constant 0 : index
    %15 = vector.load %arg6[%c0_11, %c0_12] : memref<2x128xf32, #tpu.memory_space<vmem>>, vector<2x128xf32>
    tpu.vector_store %arg6[%c0_11, %c0_12], %14 {strides = array<i32>} : memref<2x128xf32, #tpu.memory_space<vmem>>, vector<2x128xf32>,
    return
  }
  func.func @transform_0(%arg0: i32) -> (i32, i32) {
    %c0_i32 = arith.constant 0 : i32
    %c0_i32_0 = arith.constant 0 : i32
    %c0_i32_1 = arith.constant 0 : i32
    return %c0_i32, %c0_i32_0 : i32, i32
  }
  func.func @transform_1(%arg0: i32) -> (i32, i32) {
    %c0_i32 = arith.constant 0 : i32
    %c0_i32_0 = arith.constant 0 : i32
    %c0_i32_1 = arith.constant 0 : i32
    return %c0_i32, %c0_i32_0 : i32, i32
  }
  func.func @transform_2(%arg0: i32) -> (i32, i32) {
    %c0_i32 = arith.constant 0 : i32
    %c0_i32_0 = arith.constant 0 : i32
    %c0_i32_1 = arith.constant 0 : i32
    return %c0_i32, %c0_i32_0 : i32, i32
  }
  func.func @transform_3(%arg0: i32) -> (i32, i32) {
    %c0_i32 = arith.constant 0 : i32
    %c0_i32_0 = arith.constant 0 : i32
    %c0_i32_1 = arith.constant 0 : i32
    return %c0_i32, %c0_i32_0 : i32, i32
  }
  func.func @transform_4(%arg0: i32) -> (i32, i32) {
    %c0_i32 = arith.constant 0 : i32
    %c0_i32_0 = arith.constant 0 : i32
    %c0_i32_1 = arith.constant 0 : i32
    return %c0_i32, %c0_i32_0 : i32, i32
  }
  func.func @transform_5(%arg0: i32) -> (i32, i32) {
    %c0_i32 = arith.constant 0 : i32
    %c0_i32_0 = arith.constant 0 : i32
    %c0_i32_1 = arith.constant 0 : i32
    return %c0_i32, %c0_i32_0 : i32, i32
  }
}

</mosaic_0001>

<bundles_post_ra>
// kernel: bert_classifier_forward.10
= control target key start
LH: loop header
LB: loop body
LE: loop exit
PB: predicated region body
PF: predicated region fallthrough
CT: control target
= control target key end

     0   :  { %s124_s0 = inlined_call_operand.vmem [shape: bf16[16,128], index: 0, kind: input, shape index: {}]   ;;  %s125_s1 = inlined_call_operand.vmem [shape: f32[1,128], index: 1, kind: input, shape index: {}]   ;;  %s126_s2 = inlined_call_operand.vmem [shape: f32[1,128], index: 2, kind: input, shape index: {}]   ;;  %s127_s3 = inlined_call_operand.vmem [shape: bf16[16,128], index: 3, kind: output, shape index: {}]  }
   0x1   :  { %v80_v0 = vld [vmem:[%s124_s0] sm:$0xff]  }
   0x2   :  { %v81_v1 = vunpack.c.l.bf16 %v80_v0  ;;  %v82_v2 = vunpack.c.h.bf16 %v80_v0  ;;  %v73_v19 = vld [vmem:[%s125_s1] ss:$0 sm:$0xff] }
   0x3   :  { %v74_v23 = vld [vmem:[%s126_s2] ss:$0 sm:$0xff] }
   0x4   :  { %18 = vadd.xlane.f32.xlu0 %v81_v1 }
   0x8   :  { %20 = vadd.xlane.f32.xlu0 %v82_v2 }
  0x91   :  { %v19_v3 = vpop.xlane.xlu0 %18 }
  0x92   :  { %v23_v4 = vmul.f32 0.0078125, %v19_v3 }
  0x94   :  { %v25_v5 = vsub.f32 %v81_v1, %v23_v4 }
  0x95   :  { %v21_v6 = vpop.xlane.xlu0 %20 }
  0x96   :  { %v24_v7 = vmul.f32 0.0078125, %v21_v6  ;;  %v27_v8 = vmul.f32 %v25_v5, %v25_v5 }
  0x98   :  { %v26_v9 = vsub.f32 %v82_v2, %v24_v7  ;;  %29 = vadd.xlane.f32.xlu1 %v27_v8 }
  0x9a   :  { %v28_v10 = vmul.f32 %v26_v9, %v26_v9 }
  0x9c   :  { %31 = vadd.xlane.f32.xlu1 %v28_v10 }
 0x125   :  { %v30_v11 = vpop.xlane.xlu1 %29 }
 0x126   :  { %v33_v12 = vmul.f32 0.0078125, %v30_v11 }
 0x128   :  { %v35_v13 = vadd.f32 1e-12, %v33_v12 }
 0x129   :  { %v32_v14 = vpop.xlane.xlu1 %31 }
 0x12a   :  { %88 = vrsqrt.f32 %v35_v13  ;;  %v34_v15 = vmul.f32 0.0078125, %v32_v14 }
 0x12c   :  { %v36_v16 = vadd.f32 1e-12, %v34_v15 }
 0x12e   :  { %90 = vrsqrt.f32 %v36_v16 }
 0x134   :  { %v89_v17 = vpop.eup %88 }
 0x135   :  { %v39_v18 = vmul.f32 %v89_v17, %v25_v5 }
 0x137   :  { %v48_v21 = vmul.f32 %v73_v19, %v39_v18 }
 0x138   :  { %v91_v20 = vpop.eup %90 }
 0x139   :  { %v40_v22 = vmul.f32 %v91_v20, %v26_v9  ;;  %v57_v25 = vadd.f32 %v74_v23, %v48_v21 }
 0x13b   :  { %v49_v24 = vmul.f32 %v73_v19, %v40_v22 }
 0x13d   :  { %v58_v26 = vadd.f32 %v74_v23, %v49_v24 }
 0x13f   :  { %v86_v27 = vpack.c.bf16 %v58_v26, %v57_v25 }
 0x141   :  { %87 = vst [vmem:[%s127_s3] sm:$0xff] %v86_v27  }

// kernel: bert_classifier_forward.12
= control target key start
LH: loop header
LB: loop body
LE: loop exit
PB: predicated region body
PF: predicated region fallthrough
CT: control target
= control target key end

     0   :  { %v293_v0 = vmov 0.0   ;;  %vm294_vm0 = vmmov 0   ;;  %s372_s1 = inlined_call_operand.vmem [shape: bf16[128,128], index: 1, kind: input, shape index: {}]   ;;  %s373_s0 = inlined_call_operand.vmem [shape: bf16[16,128], index: 0, kind: input, shape index: {}]   ;;  %s374_s3 = inlined_call_operand.vmem [shape: bf16[16,128], index: 3, kind: input, shape index: {}]   ;;  %s375_s2 = inlined_call_operand.vmem [shape: f32[1,128], index: 2, kind: input, shape index: {}]   ;;  %s376_s4 = inlined_call_operand.vmem [shape: f32[1,128], index: 4, kind: input, shape index: {}]   ;;  %s377_s5 = inlined_call_operand.vmem [shape: f32[1,128], index: 5, kind: input, shape index: {}]   ;;  %s378_s6 = inlined_call_operand.vmem [shape: bf16[16,128], index: 6, kind: output, shape index: {}]  }
   0x1   :  { %258 = vmatprep.subr.bf16.mxu0 %v293_v0  ;;  %v280_v1 = vld [vmem:[%s372_s1] sm:$0xff]   ;;  %274 = vmatprep.mubr.msk.bf16.mxu0 %vm294_vm0, %v293_v0  ;;  %v281_v2 = vld [vmem:[%s372_s1 + $0x8] sm:$0xff]   ;;  %v282_v3 = vld [vmem:[%s372_s1 + $0x10] sm:$0xff]  }
   0x2   :  { %259 = vmatpush3.bf16.msra.mxu0 %v280_v1  ;;  %v283_v4 = vld [vmem:[%s372_s1 + $0x18] sm:$0xff]   ;;  %v284_v5 = vld [vmem:[%s372_s1 + $0x20] sm:$0xff]   ;;  %v285_v6 = vld [vmem:[%s372_s1 + $0x28] sm:$0xff]  }
   0x3   :  { %260 = vmatprep.subr.bf16.mxu0 %v293_v0  ;;  %v286_v7 = vld [vmem:[%s372_s1 + $0x30] sm:$0xff]   ;;  %v287_v8 = vld [vmem:[%s372_s1 + $0x38] sm:$0xff]   ;;  %v288_v9 = vld [vmem:[%s373_s0] sm:$0xff]  }
   0x4   :  { %v241_v10 = vld [vmem:[%s374_s3] sm:$0xff]  }
   0x5   :  { %v233_v11 = vld [vmem:[%s375_s2] ss:$0 sm:$0xff]  ;;  %v242_v12 = vunpack.c.l.bf16 %v241_v10  ;;  %v243_v20 = vunpack.c.h.bf16 %v241_v10 }
   0x6   :  { %261 = vmatpush3.bf16.msra.mxu0 %v281_v2  ;;  %v234_v38 = vld [vmem:[%s376_s4] ss:$0 sm:$0xff] }
   0x7   :  { %262 = vmatprep.subr.bf16.mxu0 %v293_v0  ;;  %v235_v42 = vld [vmem:[%s377_s5] ss:$0 sm:$0xff] }
   0xa   :  { %263 = vmatpush3.bf16.msra.mxu0 %v282_v3 }
   0xb   :  { %264 = vmatprep.subr.bf16.mxu0 %v293_v0 }
   0xe   :  { %265 = vmatpush3.bf16.msra.mxu0 %v283_v4 }
   0xf   :  { %266 = vmatprep.subr.bf16.mxu0 %v293_v0 }
  0x12   :  { %267 = vmatpush3.bf16.msra.mxu0 %v284_v5 }
  0x13   :  { %268 = vmatprep.subr.bf16.mxu0 %v293_v0 }
  0x16   :  { %269 = vmatpush3.bf16.msra.mxu0 %v285_v6 }
  0x17   :  { %270 = vmatprep.subr.bf16.mxu0 %v293_v0 }
  0x1a   :  { %271 = vmatpush3.bf16.msra.mxu0 %v286_v7 }
  0x1b   :  { %272 = vmatprep.subr.bf16.mxu0 %v293_v0 }
  0x1e   :  { %273 = vmatpush3.bf16.msra.mxu0 %v287_v8 }
  0x21   :  { %275 = vmatmul.mubr.bf16.vlgmr.msra.gmra.mrb[0].mxu0 %v288_v9 }
  0xf4   :  { %v138_v13 = vpop.f32.mrb[0].mxu0 }
  0xf5   :  { %v161_v14 = vadd.f32 %v233_v11, %v138_v13  ;;  %v276_v15 = vpop.f32.mrb[1].mxu0 }
  0xf6   :  { %v141_v16 = vpop.f32.mrb[2].mxu0 }
  0xf7   :  { %v162_v17 = vadd.f32 %v233_v11, %v141_v16  ;;  %v277_v18 = vpop.f32.mrb[3].mxu0  ;;  %v167_v19 = vadd.f32 %v242_v12, %v161_v14 }
  0xf9   :  { %169 = vadd.xlane.f32.xlu0 %v167_v19  ;;  %v168_v21 = vadd.f32 %v243_v20, %v162_v17 }
  0xfd   :  { %171 = vadd.xlane.f32.xlu0 %v168_v21 }
 0x186   :  { %v170_v22 = vpop.xlane.xlu0 %169 }
 0x187   :  { %v174_v23 = vmul.f32 0.0078125, %v170_v22 }
 0x189   :  { %v176_v24 = vsub.f32 %v167_v19, %v174_v23 }
 0x18a   :  { %v172_v25 = vpop.xlane.xlu0 %171 }
 0x18b   :  { %v175_v26 = vmul.f32 0.0078125, %v172_v25  ;;  %v178_v27 = vmul.f32 %v176_v24, %v176_v24 }
 0x18d   :  { %v177_v28 = vsub.f32 %v168_v21, %v175_v26  ;;  %180 = vadd.xlane.f32.xlu1 %v178_v27 }
 0x18f   :  { %v179_v29 = vmul.f32 %v177_v28, %v177_v28 }
 0x191   :  { %182 = vadd.xlane.f32.xlu1 %v179_v29 }
 0x21a   :  { %v181_v30 = vpop.xlane.xlu1 %180 }
 0x21b   :  { %v184_v31 = vmul.f32 0.0078125, %v181_v30 }
 0x21d   :  { %v186_v32 = vadd.f32 1e-12, %v184_v31 }
 0x21e   :  { %v183_v33 = vpop.xlane.xlu1 %182 }
 0x21f   :  { %289 = vrsqrt.f32 %v186_v32  ;;  %v185_v34 = vmul.f32 0.0078125, %v183_v33 }
 0x221   :  { %v187_v35 = vadd.f32 1e-12, %v185_v34 }
 0x223   :  { %291 = vrsqrt.f32 %v187_v35 }
 0x229   :  { %v290_v36 = vpop.eup %289 }
 0x22a   :  { %v190_v37 = vmul.f32 %v290_v36, %v176_v24 }
 0x22c   :  { %v199_v40 = vmul.f32 %v234_v38, %v190_v37 }
 0x22d   :  { %v292_v39 = vpop.eup %291 }
 0x22e   :  { %v191_v41 = vmul.f32 %v292_v39, %v177_v28  ;;  %v208_v44 = vadd.f32 %v235_v42, %v199_v40 }
 0x230   :  { %v200_v43 = vmul.f32 %v234_v38, %v191_v41 }
 0x232   :  { %v209_v45 = vadd.f32 %v235_v42, %v200_v43 }
 0x234   :  { %v247_v46 = vpack.c.bf16 %v209_v45, %v208_v44 }
 0x236   :  { %248 = vst [vmem:[%s378_s6] sm:$0xff] %v247_v46  }

// kernel: bert_classifier_forward.13
= control target key start
LH: loop header
LB: loop body
LE: loop exit
PB: predicated region body
PF: predicated region fallthrough
CT: control target
= control target key end

     0   :  { %v314_v1 = vmov 0   ;;  %v191_v18 = vlaneseq  ;;  %s395_s1 = inlined_call_operand.vmem [shape: bf16[128,256], index: 1, kind: input, shape index: {}]   ;;  %s396_s0 = inlined_call_operand.vmem [shape: bf16[16,128], index: 0, kind: input, shape index: {}]   ;;  %s397_s2 = inlined_call_operand.vmem [shape: f32[1,256], index: 2, kind: input, shape index: {}]   ;;  %s398_s3 = inlined_call_operand.vmem [shape: bf16[16,256], index: 3, kind: output, shape index: {}]  }
   0x1   :  { %v281_v0 = vld [vmem:[%s395_s1 + $0x4] ss:$8 sps:$4 sm:$0xff]   ;;  %163 = vmatprep.mubr.bf16.mxu0 %v314_v1  ;;  %v283_v2 = vld [vmem:[%s395_s1] ss:$8 sps:$4 sm:$0xff]   ;;  %v284_v3 = vld [vmem:[%s395_s1 + $0x14] ss:$8 sps:$4 sm:$0xff]  }
   0x2   :  { %131 = vmatprep.subr.bf16.mxu0 %v281_v0  ;;  %v286_v4 = vld [vmem:[%s395_s1 + $0x10] ss:$8 sps:$4 sm:$0xff]   ;;  %v287_v5 = vld [vmem:[%s395_s1 + $0x24] ss:$8 sps:$4 sm:$0xff]   ;;  %v289_v6 = vld [vmem:[%s395_s1 + $0x20] ss:$8 sps:$4 sm:$0xff]  }
   0x3   :  { %132 = vmatpush1.bf16.msra.mxu0 %v283_v2  ;;  %v290_v7 = vld [vmem:[%s395_s1 + $0x34] ss:$8 sps:$4 sm:$0xff]   ;;  %v292_v8 = vld [vmem:[%s395_s1 + $0x30] ss:$8 sps:$4 sm:$0xff]   ;;  %v293_v9 = vld [vmem:[%s395_s1 + $0x44] ss:$8 sps:$4 sm:$0xff]  }
   0x4   :  { %133 = vmatprep.subr.bf16.mxu0 %v284_v3  ;;  %v295_v10 = vld [vmem:[%s395_s1 + $0x40] ss:$8 sps:$4 sm:$0xff]   ;;  %v296_v11 = vld [vmem:[%s395_s1 + $0x54] ss:$8 sps:$4 sm:$0xff]   ;;  %v298_v12 = vld [vmem:[%s395_s1 + $0x50] ss:$8 sps:$4 sm:$0xff]  }
   0x5   :  { %v299_v13 = vld [vmem:[%s395_s1 + $0x64] ss:$8 sps:$4 sm:$0xff]   ;;  %v301_v14 = vld [vmem:[%s395_s1 + $0x60] ss:$8 sps:$4 sm:$0xff]   ;;  %v302_v15 = vld [vmem:[%s395_s1 + $0x74] ss:$8 sps:$4 sm:$0xff]  }
   0x6   :  { %v304_v16 = vld [vmem:[%s395_s1 + $0x70] ss:$8 sps:$4 sm:$0xff]   ;;  %v305_v17 = vld [vmem:[%s396_s0] sm:$0xff]   ;;  %v192_v19 = vshrl.u32 %v191_v18, 7 }
   0x7   :  { %134 = vmatpush1.bf16.msra.mxu0 %v286_v4  ;;  %v189_v21 = vld [vmem:[%s397_s2] sm:$0x3] }
   0x8   :  { %135 = vmatprep.subr.bf16.mxu0 %v287_v5  ;;  %v193_v20 = vsub.s32 0, %v192_v19  ;;  %v197_v22 = vsub.s32 1, %v192_v19 }
   0xa   :  { %v194_v23 = vrot.slane %v189_v21, %v193_v20  ;;  %v198_v24 = vrot.slane %v189_v21, %v197_v22 }
   0xb   :  { %136 = vmatpush1.bf16.msra.mxu0 %v289_v6 }
   0xc   :  { %137 = vmatprep.subr.bf16.mxu0 %v290_v7 }
   0xf   :  { %138 = vmatpush1.bf16.msra.mxu0 %v292_v8 }
  0x10   :  { %139 = vmatprep.subr.bf16.mxu0 %v293_v9 }
  0x13   :  { %140 = vmatpush1.bf16.msra.mxu0 %v295_v10 }
  0x14   :  { %141 = vmatprep.subr.bf16.mxu0 %v296_v11 }
  0x17   :  { %142 = vmatpush1.bf16.msra.mxu0 %v298_v12 }
  0x18   :  { %143 = vmatprep.subr.bf16.mxu0 %v299_v13 }
  0x1b   :  { %144 = vmatpush1.bf16.msra.mxu0 %v301_v14 }
  0x1c   :  { %145 = vmatprep.subr.bf16.mxu0 %v302_v15 }
  0x1f   :  { %146 = vmatpush1.bf16.msra.mxu0 %v304_v16 }
  0x22   :  { %164 = vmatmul.mubr.bf16.vlgmr.msra.gmra.mrb[0].mxu0 %v305_v17 }
  0xf5   :  { %v165_v25 = vpop.f32.mrb[0].mxu0 }
  0xf6   :  { %v201_v26 = vadd.f32 %v194_v23, %v165_v25  ;;  %v167_v27 = vpop.f32.mrb[1].mxu0 }
  0xf7   :  { %v202_v28 = vadd.f32 %v198_v24, %v167_v27  ;;  %v169_v29 = vpop.f32.mrb[2].mxu0 }
  0xf8   :  { %v205_v30 = vmul.f32 %v201_v26, %v201_v26  ;;  %v203_v31 = vadd.f32 %v194_v23, %v169_v29  ;;  %v171_v32 = vpop.f32.mrb[3].mxu0 }
  0xf9   :  { %v206_v33 = vmul.f32 %v202_v28, %v202_v28  ;;  %v204_v34 = vadd.f32 %v198_v24, %v171_v32 }
  0xfa   :  { %v209_v35 = vmul.f32 %v205_v30, %v201_v26  ;;  %v207_v36 = vmul.f32 %v203_v31, %v203_v31 }
  0xfb   :  { %v210_v37 = vmul.f32 %v206_v33, %v202_v28  ;;  %v208_v38 = vmul.f32 %v204_v34, %v204_v34 }
  0xfc   :  { %v213_v39 = vmul.f32 0.044715, %v209_v35  ;;  %v211_v40 = vmul.f32 %v207_v36, %v203_v31 }
  0xfd   :  { %v214_v41 = vmul.f32 0.044715, %v210_v37  ;;  %v212_v42 = vmul.f32 %v208_v38, %v204_v34 }
  0xfe   :  { %v217_v43 = vadd.f32 %v213_v39, %v201_v26  ;;  %v215_v44 = vmul.f32 0.044715, %v211_v40 }
  0xff   :  { %v218_v45 = vadd.f32 %v214_v41, %v202_v28  ;;  %v216_v46 = vmul.f32 0.044715, %v212_v42 }
 0x100   :  { %v221_v47 = vmul.f32 0.7978846, %v217_v43  ;;  %v219_v48 = vadd.f32 %v215_v44, %v203_v31 }
 0x101   :  { %v222_v49 = vmul.f32 0.7978846, %v218_v45  ;;  %v220_v50 = vadd.f32 %v216_v46, %v204_v34 }
 0x102   :  { %306 = vtanh.f32 %v221_v47  ;;  %v223_v51 = vmul.f32 0.7978846, %v219_v48 }
 0x103   :  { %308 = vtanh.f32 %v222_v49  ;;  %v224_v52 = vmul.f32 0.7978846, %v220_v50 }
 0x104   :  { %310 = vtanh.f32 %v223_v51 }
 0x105   :  { %312 = vtanh.f32 %v224_v52 }
 0x10c   :  { %v307_v53 = vpop.eup %306 }
 0x10d   :  { %v309_v54 = vpop.eup %308  ;;  %v229_v55 = vadd.f32 1.0, %v307_v53 }
 0x10e   :  { %v311_v56 = vpop.eup %310  ;;  %v230_v57 = vadd.f32 1.0, %v309_v54 }
 0x10f   :  { %v313_v58 = vpop.eup %312  ;;  %v233_v59 = vmul.f32 0.5, %v229_v55  ;;  %v231_v60 = vadd.f32 1.0, %v311_v56 }
 0x110   :  { %v234_v61 = vmul.f32 0.5, %v230_v57  ;;  %v232_v62 = vadd.f32 1.0, %v313_v58 }
 0x111   :  { %v237_v63 = vmul.f32 %v233_v59, %v201_v26  ;;  %v235_v0 = vmul.f32 0.5, %v231_v60 }
 0x112   :  { %v238_v1 = vmul.f32 %v234_v61, %v202_v28  ;;  %v236_v2 = vmul.f32 0.5, %v232_v62 }
 0x113   :  { %v239_v3 = vmul.f32 %v235_v0, %v203_v31 }
 0x114   :  { %v278_v4 = vpack.c.bf16 %v238_v1, %v237_v63  ;;  %v240_v5 = vmul.f32 %v236_v2, %v204_v34 }
 0x116   :  { %253 = vst [vmem:[%s398_s3] sm:$0xff] %v278_v4  ;;  %v279_v6 = vpack.c.bf16 %v240_v5, %v239_v3 }
 0x118   :  { %254 = vst [vmem:[%s398_s3 + $0x8] sm:$0xff] %v279_v6 }

// kernel: bert_classifier_forward.11
= control target key start
LH: loop header
LB: loop body
LE: loop exit
PB: predicated region body
PF: predicated region fallthrough
CT: control target
= control target key end

     0   :  { %s1464_s27 = smov 0   ;;  %s1466_s28 = smov 0   ;;  %s1652_s0 = inlined_call_operand.vmem [shape: f32[2,1,8], index: 0, kind: input, shape index: {}]   ;;  %s1653_s1 = inlined_call_operand.vmem [shape: bf16[16,128], index: 1, kind: input, shape index: {}]   ;;  %s1654_s2 = inlined_call_operand.vmem [shape: bf16[128,128], index: 2, kind: input, shape index: {}]   ;;  %s1655_s3 = inlined_call_operand.vmem [shape: bf16[128,128], index: 3, kind: input, shape index: {}]   ;;  %s1656_s4 = inlined_call_operand.vmem [shape: bf16[128,128], index: 4, kind: input, shape index: {}]   ;;  %s1657_s5 = inlined_call_operand.vmem [shape: f32[1,128], index: 5, kind: input, shape index: {}]   ;;  %s1658_s6 = inlined_call_operand.vmem [shape: f32[1,128], index: 6, kind: input, shape index: {}]   ;;  %s1659_s7 = inlined_call_operand.vmem [shape: f32[1,128], index: 7, kind: input, shape index: {}]   ;;  %s1660_s8 = inlined_call_operand.vmem [shape: bf16[16,128], index: 8, kind: output, shape index: {}]  }
   0x1   :  { %s1468_s29 = smov 0  }
   0x2 LB: > { %s30_s30 = sadd.s32 1, %s1410_s28  ;;  %p1178_p0 = scmp.ge.s32.totalorder %s1414_s29, 1  ;;  %s1414_s29 = sphi %s1468_s29, %s18_s29   ;;  %s1410_s28 = sphi %s1466_s28, %s1662_s28   ;;  %s1406_s27 = sphi %s1464_s27, %s1661_s27  }
   0x3   : > { %p32_p1 = scmp.ge.s32.totalorder %s30_s30, 2  ;;  %p334_p2 = scmp.lt.s32.totalorder %s1414_s29, 3 }
   0x5   : > { %s1664_s30 = smov (%p32_p1, %s30_s30), 0  ;;  %p335_p3 = pnand %p1178_p0, %p334_p2 }
   0x6   : > { %v1360_v0 = vld [vmem:[%s1655_s3] sm:$0xff] (!%p335_p3)   ;;  %v1416_v1 = vmov (!%p335_p3), 0.0   ;;  %v1361_v2 = vld [vmem:[%s1655_s3 + $0x8] sm:$0xff] (!%p335_p3)   ;;  %vm1417_vm0 = vmmov (!%p335_p3), 0   ;;  %v1363_v5 = vld [vmem:[%s1655_s3 + $0x10] sm:$0xff] (!%p335_p3)   ;;  %p393_p4 = scmp.lt.s32.totalorder (!%p335_p3), %s1406_s27, 1  ;;  %v818_v41 = vlaneseq (!%p335_p3) }
   0x7   : > { %338 = sbr.rel (%p335_p3) target bundleno = 1666 (0x682), region = 52  ;;  %1269 = vmatprep.subr.bf16.mxu1 (!%p335_p3), %v1416_v1  ;;  %1249 = vmatprep.subr.bf16.mxu0 (!%p335_p3), %v1416_v1  ;;  %v1362_v3 = vld [vmem:[%s1654_s2] sm:$0xff] (!%p335_p3)   ;;  %v1364_v4 = vld [vmem:[%s1654_s2 + $0x8] sm:$0xff] (!%p335_p3)   ;;  %v1366_v6 = vld [vmem:[%s1654_s2 + $0x10] sm:$0xff] (!%p335_p3)   ;;  %vm769_vm1 = vcmask (!%p335_p3), 523264   ;;  %s1418_s13 = smov (!%p335_p3), 64  }
   0x8   : > { %1270 = vmatpush3.bf16.msra.mxu1 (!%p335_p3), %v1360_v0  ;;  %1285 = vmatprep.mubr.msk.bf16.mxu1 (!%p335_p3), %vm1417_vm0, %v1416_v1  ;;  %v1365_v7 = vld [vmem:[%s1655_s3 + $0x18] sm:$0xff] (!%p335_p3)   ;;  %v1367_v9 = vld [vmem:[%s1655_s3 + $0x20] sm:$0xff] (!%p335_p3)   ;;  %v1369_v10 = vld [vmem:[%s1655_s3 + $0x28] sm:$0xff] (!%p335_p3)   ;;  %v819_v44 = vshrl.u32 (!%p335_p3), %v818_v41, 7  ;;  %vm824_vm2 = vcmask (!%p335_p3), 64512   ;;  %vm840_vm3 = vcmask (!%p335_p3), 1043456  }
   0x9   : > { %1271 = vmatprep.subr.bf16.mxu1 (!%p335_p3), %v1416_v1  ;;  %1265 = vmatprep.mubr.msk.bf16.mxu0 (!%p335_p3), %vm1417_vm0, %v1416_v1  ;;  %v1368_v8 = vld [vmem:[%s1654_s2 + $0x18] sm:$0xff] (!%p335_p3)   ;;  %v1370_v11 = vld [vmem:[%s1654_s2 + $0x20] sm:$0xff] (!%p335_p3)   ;;  %v1372_v12 = vld [vmem:[%s1654_s2 + $0x28] sm:$0xff] (!%p335_p3)  }
   0xa   : > { %1250 = vmatpush3.bf16.msra.mxu0 (!%p335_p3), %v1362_v3  ;;  %v1371_v13 = vld [vmem:[%s1655_s3 + $0x30] sm:$0xff] (!%p335_p3)   ;;  %v1373_v15 = vld [vmem:[%s1655_s3 + $0x38] sm:$0xff] (!%p335_p3)   ;;  %v1190_v18 = vld [vmem:[%s1658_s6] ss:$0 sm:$0xff] (!%p335_p3)  ;;  %v820_v46 = vsub.s32 (!%p335_p3), 0, %v819_v44 }
   0xb   : > { %1251 = vmatprep.subr.bf16.mxu0 (!%p335_p3), %v1416_v1  ;;  %v1374_v14 = vld [vmem:[%s1654_s2 + $0x30] sm:$0xff] (!%p335_p3)   ;;  %v1375_v16 = vld [vmem:[%s1654_s2 + $0x38] sm:$0xff] (!%p335_p3)   ;;  %v1181_v20 = vld [vmem:[%s1657_s5] ss:$0 sm:$0xff] (!%p335_p3) }
   0xc   : > { %1272 = vmatpush3.bf16.msra.mxu1 (!%p335_p3), %v1361_v2  ;;  %v1376_v33 = vld [vmem:[%s1656_s4] sm:$0xff] (!%p335_p3)   ;;  %v1377_v34 = vld [vmem:[%s1656_s4 + $0x8] sm:$0xff] (!%p335_p3)   ;;  %v1378_v35 = vld [vmem:[%s1656_s4 + $0x10] sm:$0xff] (!%p335_p3)  }
   0xd   : > { %1273 = vmatprep.subr.bf16.mxu1 (!%p335_p3), %v1416_v1  ;;  %v1379_v36 = vld [vmem:[%s1656_s4 + $0x18] sm:$0xff] (!%p335_p3)   ;;  %v1380_v37 = vld [vmem:[%s1656_s4 + $0x20] sm:$0xff] (!%p335_p3)   ;;  %v1381_v38 = vld [vmem:[%s1656_s4 + $0x28] sm:$0xff] (!%p335_p3)  }
   0xe   : > { %1252 = vmatpush3.bf16.msra.mxu0 %v1364_v4  ;;  %s1666_s27 = smov (!%p393_p4, %s1406_s27), 1  ;;  %v1382_v39 = vld [vmem:[%s1656_s4 + $0x30] sm:$0xff]   ;;  %v1383_v40 = vld [vmem:[%s1656_s4 + $0x38] sm:$0xff]   ;;  %v1199_v55 = vld [vmem:[%s1659_s7] ss:$0 sm:$0xff] }
   0xf   : > { %1253 = vmatprep.subr.bf16.mxu0 %v1416_v1  ;;  %s1179_s19 = sshll.u32 %s1666_s27, 2  ;;  %s395_s16 = scalar_lea.vmem %s1652_s0, %s1666_s27 }
  0x10   : > { %1274 = vmatpush3.bf16.msra.mxu1 %v1363_v5  ;;  %s399_s24 = scalar_lea.vmem %s1653_s1, %s1179_s19  ;;  %v430_v42 = vld [vmem:[%s395_s16] sm:$0x1]  ;;  %s427_s22 = scalar_lea.vmem %s1660_s8, %s1179_s19 }
  0x11   : > { %1275 = vmatprep.subr.bf16.mxu1 %v1416_v1  ;;  %v429_v17 = vld [vmem:[%s399_s24] sm:$0xf]  ;;  %v431_v43 = vsub.f32 1.0, %v430_v42 }
  0x12   : > { %1254 = vmatpush3.bf16.msra.mxu0 %v1366_v6 }
  0x13   : > { %1255 = vmatprep.subr.bf16.mxu0 %v1416_v1  ;;  %v432_v45 = vmul.f32 -1e+09, %v431_v43 }
  0x14   : > { %1276 = vmatpush3.bf16.msra.mxu1 %v1365_v7 }
  0x15   : > { %1277 = vmatprep.subr.bf16.mxu1 %v1416_v1  ;;  %v821_v47 = vrot.slane %v432_v45, %v820_v46 }
  0x16   : > { %1256 = vmatpush3.bf16.msra.mxu0 %v1368_v8 }
  0x17   : > { %1257 = vmatprep.subr.bf16.mxu0 %v1416_v1 }
  0x18   : > { %1278 = vmatpush3.bf16.msra.mxu1 %v1367_v9 }
  0x19   : > { %1279 = vmatprep.subr.bf16.mxu1 %v1416_v1 }
  0x1a   : > { %1258 = vmatpush3.bf16.msra.mxu0 %v1370_v11 }
  0x1b   : > { %1259 = vmatprep.subr.bf16.mxu0 %v1416_v1 }
  0x1c   : > { %1280 = vmatpush3.bf16.msra.mxu1 %v1369_v10 }
  0x1d   : > { %1281 = vmatprep.subr.bf16.mxu1 %v1416_v1 }
  0x1e   : > { %1260 = vmatpush3.bf16.msra.mxu0 %v1372_v12 }
  0x1f   : > { %1261 = vmatprep.subr.bf16.mxu0 %v1416_v1 }
  0x20   : > { %1282 = vmatpush3.bf16.msra.mxu1 %v1371_v13 }
  0x21   : > { %1283 = vmatprep.subr.bf16.mxu1 %v1416_v1 }
  0x22   : > { %1262 = vmatpush3.bf16.msra.mxu0 %v1374_v14 }
  0x23   : > { %1263 = vmatprep.subr.bf16.mxu0 %v1416_v1 }
  0x24   : > { %1284 = vmatpush3.bf16.msra.mxu1 %v1373_v15 }
  0x25   : > { %1309 = vmatprep.subr.bf16.mxu1 %v1416_v1 }
  0x26   : > { %1264 = vmatpush3.bf16.msra.mxu0 %v1375_v16 }
  0x27   : > { %1286 = vmatmul.mubr.bf16.vlgmr.msra.gmra.mrb[0].mxu1 %v429_v17  ;;  %1289 = vmatprep.subr.bf16.mxu0 %v1416_v1 }
  0x28   : > { %1311 = vmatprep.mubr.msk.bf16.mxu1 %vm1417_vm0, %v1416_v1 }
  0x29   : > { %1266 = vmatmul.mubr.bf16.vlgmr.msra.gmra.mrb[0].mxu0 %v429_v17 }
  0x2a   : > { %1305 = vmatprep.mubr.msk.bf16.mxu0 %vm1417_vm0, %v1416_v1  ;;  %1290 = vmatpush3.bf16.msra.mxu0 %v1376_v33 }
  0x2b   : > { %1291 = vmatprep.subr.bf16.mxu0 %v1416_v1 }
  0x2e   : > { %1292 = vmatpush3.bf16.msra.mxu0 %v1377_v34 }
  0x2f   : > { %1293 = vmatprep.subr.bf16.mxu0 %v1416_v1 }
  0x32   : > { %1294 = vmatpush3.bf16.msra.mxu0 %v1378_v35 }
  0x33   : > { %1295 = vmatprep.subr.bf16.mxu0 %v1416_v1 }
  0x36   : > { %1296 = vmatpush3.bf16.msra.mxu0 %v1379_v36 }
  0x37   : > { %1297 = vmatprep.subr.bf16.mxu0 %v1416_v1 }
  0x3a   : > { %1298 = vmatpush3.bf16.msra.mxu0 %v1380_v37 }
  0x3b   : > { %1299 = vmatprep.subr.bf16.mxu0 %v1416_v1 }
  0x3e   : > { %1300 = vmatpush3.bf16.msra.mxu0 %v1381_v38 }
  0x3f   : > { %1301 = vmatprep.subr.bf16.mxu0 %v1416_v1 }
  0x42   : > { %1302 = vmatpush3.bf16.msra.mxu0 %v1382_v39 }
  0x43   : > { %1303 = vmatprep.subr.bf16.mxu0 %v1416_v1 }
  0x46   : > { %1304 = vmatpush3.bf16.msra.mxu0 %v1383_v40 }
  0x49   : > { %1306 = vmatmul.mubr.bf16.vlgmr.msra.gmra.mrb[4].mxu0 %v429_v17 }
  0xfa   : > { %v650_v19 = vpop.f32.mrb[0].mxu1 }
  0xfb   : > { %v651_v21 = vadd.f32 %v1190_v18, %v650_v19  ;;  %v1287_v22 = vpop.f32.mrb[1].mxu1 }
  0xfc   : > { %v653_v23 = vpop.f32.mrb[2].mxu1  ;;  %v538_v24 = vpop.f32.mrb[0].mxu0 }
  0xfd   : > { %v656_v25 = vpack.c.bf16 %v651_v21, %v651_v21  ;;  %v1288_v26 = vpop.f32.mrb[3].mxu1  ;;  %v539_v27 = vadd.f32 %v1181_v20, %v538_v24  ;;  %v1267_v28 = vpop.f32.mrb[1].mxu0 }
  0xfe   : > { %v541_v29 = vpop.f32.mrb[2].mxu0 }
  0xff   : > { %v774_v30 = vsel %vm769_vm1, %v656_v25, 0  ;;  %888 = vrot.lane.b32.xlu1 %v656_v25, %s1418_s13  ;;  %v544_v31 = vpack.c.bf16 %v539_v27, %v539_v27  ;;  %v1268_v32 = vpop.f32.mrb[3].mxu0 }
 0x100   : > { %1310 = vmatpush3.bf16.xpose.msra.mxu1 %v774_v30 }
 0x101   : > { %1315 = vmatprep.subr.bf16.mxu1 %v1416_v1 }
 0x103   : > { %885 = vrot.lane.b32.xlu1 %v544_v31, %s1418_s13 }
 0x107   : > { %1312 = vmatmul.mubr.msk.bf16.vlgmr.msra.gmra.mrb[4].mxu1 %vm769_vm1, %v544_v31 }
 0x108   : > { %1317 = vmatprep.mubr.msk.bf16.mxu1 %vm1417_vm0, %v1416_v1 }
 0x11c   : > { %v762_v56 = vpop.f32.mrb[4].mxu0 }
 0x11d   : > { %v763_v57 = vadd.f32 %v1199_v55, %v762_v56  ;;  %v1307_v58 = vpop.f32.mrb[5].mxu0 }
 0x11e   : > { %v765_v59 = vpop.f32.mrb[6].mxu0 }
 0x11f   : > { %v768_v60 = vpack.c.bf16 %v763_v57, %v763_v57  ;;  %v1308_v61 = vpop.f32.mrb[7].mxu0 }
 0x121   : > { %v842_v62 = vsel %vm840_vm3, %v768_v60, 0 }
 0x122   : > { %1316 = vmatpush3.bf16.msra.mxu1 %v842_v62 }
 0x123   : > { %1321 = vmatprep.subr.bf16.mxu1 %v1416_v1 }
 0x171   : > { %v889_v8 = vpop.permute.xlu1 %888 }
 0x172   : > { %v894_v10 = vsel %vm769_vm1, %v889_v8, 0 }
 0x175   : > { %v886_v11 = vpop.permute.xlu1 %885 }
 0x1da   : > { %v810_v48 = vpop.f32.mrb[4].mxu1 }
 0x1db   : > { %v816_v49 = vmul.f32 0.125, %v810_v48  ;;  %v1313_v50 = vpop.f32.mrb[5].mxu1 }
 0x1dc   : > { %v813_v51 = vpop.f32.mrb[6].mxu1 }
 0x1dd   : > { %v1314_v52 = vpop.f32.mrb[7].mxu1  ;;  %v823_v53 = vadd.f32 %v821_v47, %v816_v49 }
 0x1df   : > { %v825_v54 = vsel %vm824_vm2, %v823_v53, -inf }
 0x1e0   : > { %826 = vmax.xlane.f32.xlu0 %v825_v54 }
 0x26d   : > { %v827_v63 = vpop.xlane.xlu0 %826 }
 0x26e   : > { %v828_v0 = vsub.f32 %v823_v53, %v827_v63 }
 0x270   : > { %v829_v2 = vmul.f32 1.442695, %v828_v0 }
 0x272   : > { %1384 = vpow2.f32 %v829_v2 }
 0x27c   : > { %v1385_v3 = vpop.eup %1384 }
 0x27d   : > { %v831_v4 = vsel %vm824_vm2, %v1385_v3, 0.0 }
 0x27e   : > { %832 = vadd.xlane.f32.xlu0 %v831_v4 }
 0x30b   : > { %v833_v5 = vpop.xlane.xlu0 %832 }
 0x30c   : > { %1386 = vrcp.f32 %v833_v5 }
 0x316   : > { %v1387_v6 = vpop.eup %1386 }
 0x317   : > { %v835_v7 = vmul.f32 %v1387_v6, %v1385_v3 }
 0x319   : > { %v836_v9 = vpack.c.bf16 %v835_v7, %v835_v7 }
 0x31b   : > { %1318 = vmatmul.mubr.msk.bf16.vlgmr.msra.gmra.mrb[8].mxu1 %vm824_vm2, %v836_v9 }
 0x31c   : > { %1322 = vmatpush3.bf16.xpose.msra.mxu1 %v894_v10  ;;  %1323 = vmatprep.mubr.msk.bf16.mxu1 %vm1417_vm0, %v1416_v1 }
 0x31d   : > { %1327 = vmatprep.subr.bf16.mxu1 %v1416_v1 }
 0x323   : > { %1324 = vmatmul.mubr.msk.bf16.vlgmr.msra.gmra.mrb[12].mxu1 %vm769_vm1, %v886_v11 }
 0x324   : > { %1329 = vmatprep.mubr.msk.bf16.mxu1 %vm1417_vm0, %v1416_v1 }
 0x3ee   : > { %v878_v12 = vpop.f32.mrb[8].mxu1 }
 0x3ef   : > { %v1319_v13 = vpop.f32.mrb[9].mxu1 }
 0x3f0   : > { %v881_v14 = vpop.f32.mrb[10].mxu1 }
 0x3f1   : > { %v1320_v15 = vpop.f32.mrb[11].mxu1 }
 0x3f6   : > { %v930_v16 = vpop.f32.mrb[12].mxu1 }
 0x3f7   : > { %v936_v17 = vmul.f32 0.125, %v930_v16  ;;  %v1325_v18 = vpop.f32.mrb[13].mxu1 }
 0x3f8   : > { %v933_v19 = vpop.f32.mrb[14].mxu1 }
 0x3f9   : > { %v1326_v20 = vpop.f32.mrb[15].mxu1  ;;  %v937_v21 = vadd.f32 %v936_v17, %v821_v47 }
 0x3fb   : > { %v938_v22 = vsel %vm824_vm2, %v937_v21, -inf }
 0x3fc   : > { %939 = vmax.xlane.f32.xlu0 %v938_v22 }
 0x412   : > { %951 = vrot.lane.b32.xlu0 %v768_v60, %s1418_s13 }
 0x489   : > { %v940_v23 = vpop.xlane.xlu0 %939 }
 0x48a   : > { %v941_v24 = vsub.f32 %v937_v21, %v940_v23 }
 0x48c   : > { %v942_v25 = vmul.f32 1.442695, %v941_v24 }
 0x48d   : > { %v952_v26 = vpop.permute.xlu0 %951 }
 0x48e   : > { %1388 = vpow2.f32 %v942_v25  ;;  %v957_v1 = vsel %vm840_vm3, %v952_v26, 0 }
 0x48f   : > { %1328 = vmatpush3.bf16.msra.mxu1 %v957_v1 }
 0x498   : > { %v1389_v27 = vpop.eup %1388 }
 0x499   : > { %v944_v28 = vsel %vm824_vm2, %v1389_v27, 0.0 }
 0x49a   : > { %945 = vadd.xlane.f32.xlu1 %v944_v28 }
 0x527   : > { %v946_v29 = vpop.xlane.xlu1 %945 }
 0x528   : > { %1390 = vrcp.f32 %v946_v29 }
 0x532   : > { %v1391_v30 = vpop.eup %1390 }
 0x533   : > { %v948_v31 = vmul.f32 %v1391_v30, %v1389_v27 }
 0x535   : > { %v949_v32 = vpack.c.bf16 %v948_v31, %v948_v31 }
 0x537   : > { %1330 = vmatmul.mubr.msk.bf16.vlgmr.msra.gmra.mrb[16].mxu1 %vm824_vm2, %v949_v32 }
 0x60a   : > { %v993_v33 = vpop.f32.mrb[16].mxu1 }
 0x60b   : > { %1000 = vrot.lane.b32.xlu0 %v993_v33, %s1418_s13  ;;  %v1331_v34 = vpop.f32.mrb[17].mxu1 }
 0x60c   : > { %v996_v35 = vpop.f32.mrb[18].mxu1 }
 0x60d   : > { %v1332_v36 = vpop.f32.mrb[19].mxu1 }
 0x67d   : > { %v1001_v37 = vpop.permute.xlu0 %1000 }
 0x67e   : > { %v1003_v38 = vsel %vm769_vm1, %v878_v12, %v1001_v37 }
 0x67f   : > { %v1004_v39 = vpack.c.bf16 %v1003_v38, %v1003_v38 }
 0x681   : > { %1005 = vst [vmem:[%s427_s22] sm:$0xf] %v1004_v39 }
 0x682 PF: > { %s18_s29 = sadd.s32 1, %s1414_s29   ;;  %s1661_s27 = smov %s1410_s28 }
 0x683   : > { %p15_p5 = scmp.ge.s32.totalorder %s18_s29, 4   ;;  %s1662_s28 = smov %s1664_s30 }
 0x685   :  { %17 = sbr.rel (!%p15_p5) target bundleno = 2 (0x2), region = 103 }

// kernel: bert_classifier_forward.14
= control target key start
LH: loop header
LB: loop body
LE: loop exit
PB: predicated region body
PF: predicated region fallthrough
CT: control target
= control target key end

     0   :  { %s475_s1 = inlined_call_operand.vmem [shape: bf16[256,128], index: 1, kind: input, shape index: {}]   ;;  %s476_s0 = inlined_call_operand.vmem [shape: bf16[16,256], index: 0, kind: input, shape index: {}]   ;;  %s477_s3 = inlined_call_operand.vmem [shape: bf16[16,128], index: 3, kind: input, shape index: {}]   ;;  %s478_s2 = inlined_call_operand.vmem [shape: f32[1,128], index: 2, kind: input, shape index: {}]   ;;  %s479_s4 = inlined_call_operand.vmem [shape: f32[1,128], index: 4, kind: input, shape index: {}]   ;;  %s480_s5 = inlined_call_operand.vmem [shape: f32[1,128], index: 5, kind: input, shape index: {}]   ;;  %s481_s6 = inlined_call_operand.vmem [shape: bf16[16,128], index: 6, kind: output, shape index: {}]  }
   0x1   :  { %v348_v0 = vld [vmem:[%s475_s1 + $0x40] sm:$0xff]   ;;  %v350_v2 = vld [vmem:[%s475_s1 + $0x48] sm:$0xff]   ;;  %v352_v4 = vld [vmem:[%s475_s1 + $0x50] sm:$0xff]  }
   0x2   :  { %v349_v1 = vld [vmem:[%s475_s1] sm:$0xff]   ;;  %326 = vmatprep.subr.bf16.mxu0 %v348_v0  ;;  %v351_v3 = vld [vmem:[%s475_s1 + $0x8] sm:$0xff]   ;;  %v353_v5 = vld [vmem:[%s475_s1 + $0x10] sm:$0xff]  }
   0x3   :  { %327 = vmatpush3.bf16.msra.mxu0 %v349_v1  ;;  %v354_v6 = vld [vmem:[%s475_s1 + $0x58] sm:$0xff]   ;;  %v356_v8 = vld [vmem:[%s475_s1 + $0x60] sm:$0xff]   ;;  %v358_v10 = vld [vmem:[%s475_s1 + $0x68] sm:$0xff]  }
   0x4   :  { %328 = vmatprep.subr.bf16.mxu0 %v350_v2  ;;  %v355_v7 = vld [vmem:[%s475_s1 + $0x18] sm:$0xff]   ;;  %v357_v9 = vld [vmem:[%s475_s1 + $0x20] sm:$0xff]   ;;  %v359_v12 = vld [vmem:[%s475_s1 + $0x28] sm:$0xff]  }
   0x5   :  { %v366_v11 = vld [vmem:[%s476_s0 + $0x4] ss:$8 sps:$4 sm:$0xff]   ;;  %v360_v13 = vld [vmem:[%s475_s1 + $0x70] sm:$0xff]   ;;  %v362_v15 = vld [vmem:[%s475_s1 + $0x78] sm:$0xff]  }
   0x6   :  { %204 = vmatprep.mubr.bf16.mxu0 %v366_v11  ;;  %v361_v14 = vld [vmem:[%s475_s1 + $0x30] sm:$0xff]   ;;  %v363_v16 = vld [vmem:[%s475_s1 + $0x38] sm:$0xff]   ;;  %v364_v17 = vld [vmem:[%s476_s0] ss:$8 sps:$4 sm:$0xff]  }
   0x7   :  { %329 = vmatpush3.bf16.msra.mxu0 %v351_v3  ;;  %v318_v18 = vld [vmem:[%s477_s3] sm:$0xff]  }
   0x8   :  { %330 = vmatprep.subr.bf16.mxu0 %v352_v4  ;;  %v310_v21 = vld [vmem:[%s478_s2] ss:$0 sm:$0xff]  ;;  %v319_v24 = vunpack.c.l.bf16 %v318_v18  ;;  %v320_v30 = vunpack.c.h.bf16 %v318_v18 }
   0x9   :  { %v311_v48 = vld [vmem:[%s479_s4] ss:$0 sm:$0xff] }
   0xa   :  { %v312_v52 = vld [vmem:[%s480_s5] ss:$0 sm:$0xff] }
   0xb   :  { %331 = vmatpush3.bf16.msra.mxu0 %v353_v5 }
   0xc   :  { %332 = vmatprep.subr.bf16.mxu0 %v354_v6 }
   0xf   :  { %333 = vmatpush3.bf16.msra.mxu0 %v355_v7 }
  0x10   :  { %334 = vmatprep.subr.bf16.mxu0 %v356_v8 }
  0x13   :  { %335 = vmatpush3.bf16.msra.mxu0 %v357_v9 }
  0x14   :  { %336 = vmatprep.subr.bf16.mxu0 %v358_v10 }
  0x17   :  { %337 = vmatpush3.bf16.msra.mxu0 %v359_v12 }
  0x18   :  { %338 = vmatprep.subr.bf16.mxu0 %v360_v13 }
  0x1b   :  { %339 = vmatpush3.bf16.msra.mxu0 %v361_v14 }
  0x1c   :  { %340 = vmatprep.subr.bf16.mxu0 %v362_v15 }
  0x1f   :  { %341 = vmatpush3.bf16.msra.mxu0 %v363_v16 }
  0x22   :  { %205 = vmatmul.mubr.bf16.vlgmr.msra.gmra.mrb[0].mxu0 %v364_v17 }
  0xf5   :  { %v342_v19 = vpop.f32.mrb[0].mxu0 }
  0xf6   :  { %v343_v20 = vpop.f32.mrb[1].mxu0 }
  0xf7   :  { %v344_v22 = vadd.f32 %v343_v20, %v342_v19  ;;  %v345_v23 = vpop.f32.mrb[2].mxu0 }
  0xf8   :  { %v346_v25 = vpop.f32.mrb[3].mxu0 }
  0xf9   :  { %v229_v26 = vadd.f32 %v344_v22, %v310_v21  ;;  %v347_v27 = vadd.f32 %v346_v25, %v345_v23 }
  0xfb   :  { %v230_v28 = vadd.f32 %v347_v27, %v310_v21  ;;  %v235_v29 = vadd.f32 %v319_v24, %v229_v26 }
  0xfd   :  { %237 = vadd.xlane.f32.xlu0 %v235_v29  ;;  %v236_v31 = vadd.f32 %v320_v30, %v230_v28 }
 0x101   :  { %239 = vadd.xlane.f32.xlu0 %v236_v31 }
 0x18a   :  { %v238_v32 = vpop.xlane.xlu0 %237 }
 0x18b   :  { %v242_v33 = vmul.f32 0.0078125, %v238_v32 }
 0x18d   :  { %v244_v34 = vsub.f32 %v235_v29, %v242_v33 }
 0x18e   :  { %v240_v35 = vpop.xlane.xlu0 %239 }
 0x18f   :  { %v243_v36 = vmul.f32 0.0078125, %v240_v35  ;;  %v246_v37 = vmul.f32 %v244_v34, %v244_v34 }
 0x191   :  { %v245_v38 = vsub.f32 %v236_v31, %v243_v36  ;;  %248 = vadd.xlane.f32.xlu1 %v246_v37 }
 0x193   :  { %v247_v39 = vmul.f32 %v245_v38, %v245_v38 }
 0x195   :  { %250 = vadd.xlane.f32.xlu1 %v247_v39 }
 0x21e   :  { %v249_v40 = vpop.xlane.xlu1 %248 }
 0x21f   :  { %v252_v41 = vmul.f32 0.0078125, %v249_v40 }
 0x221   :  { %v254_v42 = vadd.f32 1e-12, %v252_v41 }
 0x222   :  { %v251_v43 = vpop.xlane.xlu1 %250 }
 0x223   :  { %367 = vrsqrt.f32 %v254_v42  ;;  %v253_v44 = vmul.f32 0.0078125, %v251_v43 }
 0x225   :  { %v255_v45 = vadd.f32 1e-12, %v253_v44 }
 0x227   :  { %369 = vrsqrt.f32 %v255_v45 }
 0x22d   :  { %v368_v46 = vpop.eup %367 }
 0x22e   :  { %v258_v47 = vmul.f32 %v368_v46, %v244_v34 }
 0x230   :  { %v267_v50 = vmul.f32 %v311_v48, %v258_v47 }
 0x231   :  { %v370_v49 = vpop.eup %369 }
 0x232   :  { %v259_v51 = vmul.f32 %v370_v49, %v245_v38  ;;  %v276_v54 = vadd.f32 %v312_v52, %v267_v50 }
 0x234   :  { %v268_v53 = vmul.f32 %v311_v48, %v259_v51 }
 0x236   :  { %v277_v55 = vadd.f32 %v312_v52, %v268_v53 }
 0x238   :  { %v324_v56 = vpack.c.bf16 %v277_v55, %v276_v54 }
 0x23a   :  { %325 = vst [vmem:[%s481_s6] sm:$0xff] %v324_v56  }

// kernel: bert_classifier_forward.19
= control target key start
LH: loop header
LB: loop body
LE: loop exit
PB: predicated region body
PF: predicated region fallthrough
CT: control target
= control target key end

     0   :  { %v384_v1 = vmov 0.0   ;;  %vm385_vm0 = vmmov 0   ;;  %s486_s0 = inlined_call_operand.vmem [shape: bf16[2,128], index: 0, kind: input, shape index: {}]   ;;  %s487_s1 = inlined_call_operand.vmem [shape: bf16[128,128], index: 1, kind: input, shape index: {}]   ;;  %s488_s2 = inlined_call_operand.vmem [shape: f32[1,128], index: 2, kind: input, shape index: {}]   ;;  %s489_s3 = inlined_call_operand.vmem [shape: bf16[128,128], index: 3, kind: input, shape index: {}]   ;;  %s490_s4 = inlined_call_operand.vmem [shape: f32[1,128], index: 4, kind: input, shape index: {}]   ;;  %s491_s5 = inlined_call_operand.hbm [shape: f32[2,128], index: 5, kind: output, shape index: {}]  }
   0x1   :  { %v342_v0 = vld [vmem:[%s487_s1] sm:$0xff]   ;;  %299 = vmatprep.subr.bf16.mxu0 %v384_v1  ;;  %319 = vmatprep.subr.bf16.mxu1 %v384_v1  ;;  %v343_v2 = vld [vmem:[%s487_s1 + $0x8] sm:$0xff]   ;;  %v344_v3 = vld [vmem:[%s487_s1 + $0x10] sm:$0xff]  }
   0x2   :  { %300 = vmatpush3.bf16.msra.mxu0 %v342_v0  ;;  %315 = vmatprep.mubr.msk.bf16.mxu0 %vm385_vm0, %v384_v1  ;;  %v350_v4 = vld [vmem:[%s489_s3] sm:$0xff]   ;;  %v345_v5 = vld [vmem:[%s487_s1 + $0x18] sm:$0xff]   ;;  %v351_v6 = vld [vmem:[%s489_s3 + $0x8] sm:$0xff]  }
   0x3   :  { %301 = vmatprep.subr.bf16.mxu0 %v384_v1  ;;  %335 = vmatprep.mubr.msk.bf16.mxu1 %vm385_vm0, %v384_v1  ;;  %v346_v7 = vld [vmem:[%s487_s1 + $0x20] sm:$0xff]   ;;  %v352_v8 = vld [vmem:[%s489_s3 + $0x10] sm:$0xff]  }
   0x4   :  { %320 = vmatpush3.bf16.msra.mxu1 %v350_v4 }
   0x5   :  { %321 = vmatprep.subr.bf16.mxu1 %v384_v1 }
   0x6   :  { %302 = vmatpush3.bf16.msra.mxu0 %v343_v2 }
   0x7   :  { %303 = vmatprep.subr.bf16.mxu0 %v384_v1 }
   0x8   :  { %322 = vmatpush3.bf16.msra.mxu1 %v351_v6 }
   0xa   :  { %304 = vmatpush3.bf16.msra.mxu0 %v344_v3 }
   0xb   :  { %305 = vmatprep.subr.bf16.mxu0 %v384_v1 }
   0xe   :  { %306 = vmatpush3.bf16.msra.mxu0 %v345_v5 }
   0xf   :  { %307 = vmatprep.subr.bf16.mxu0 %v384_v1 }
  0x10   :  { %10 = vsyncpa [#allocation3], 0  ;;  %323 = vmatprep.subr.bf16.mxu1 %v384_v1  ;;  %v347_v9 = vld [vmem:[%s487_s1 + $0x28] sm:$0xff]   ;;  %v353_v10 = vld [vmem:[%s489_s3 + $0x18] sm:$0xff]  }
  0x11   :  { %324 = vmatpush3.bf16.msra.mxu1 %v352_v8  ;;  %v348_v11 = vld [vmem:[%s487_s1 + $0x30] sm:$0xff]   ;;  %v349_v12 = vld [vmem:[%s487_s1 + $0x38] sm:$0xff]   ;;  %v22_v13 = vld [vmem:[%s486_s0] sm:$0x1] }
  0x12   :  { %308 = vmatpush3.bf16.msra.mxu0 %v346_v7  ;;  %325 = vmatprep.subr.bf16.mxu1 %v384_v1  ;;  %v354_v14 = vld [vmem:[%s489_s3 + $0x20] sm:$0xff]   ;;  %v355_v15 = vld [vmem:[%s489_s3 + $0x28] sm:$0xff]   ;;  %v356_v16 = vld [vmem:[%s489_s3 + $0x30] sm:$0xff]  }
  0x13   :  { %309 = vmatprep.subr.bf16.mxu0 %v384_v1  ;;  %v357_v17 = vld [vmem:[%s489_s3 + $0x38] sm:$0xff]   ;;  %v263_v18 = vld [vmem:[%s488_s2] ss:$0 sm:$0xff]  ;;  %s386_s3 = smov [#allocation2]  }
  0x14   :  { %v272_v26 = vld [vmem:[%s490_s4] ss:$0 sm:$0xff]  ;;  %s255_s29 = sshll.u32 %s386_s3, 4  ;;  %s256_s29 = int_to_ptr.vmem [resolvable:$true] %s255_s29 }
  0x15   :  { %326 = vmatpush3.bf16.msra.mxu1 %v353_v10  ;;  %s360_s2 = scalar_lea.vmem %s256_s29, 32  ;;  %p365_p1 = scmp.lt.s32.totalorder %s256_s29, %s256_s29 }
  0x16   :  { %310 = vmatpush3.bf16.msra.mxu0 %v347_v9  ;;  %327 = vmatprep.subr.bf16.mxu1 %v384_v1  ;;  %p361_p0 = scmp.ne.s32.totalorder %s256_s29, %s360_s2  ;;  %p366_p2 = scmp.lt.s32.totalorder %s360_s2, %s360_s2 }
  0x17   :  { %311 = vmatprep.subr.bf16.mxu0 %v384_v1 }
  0x18   :  { %p367_p3 = por %p366_p2, %p365_p1 }
  0x19   :  { %328 = vmatpush3.bf16.msra.mxu1 %v354_v14 }
  0x1a   :  { %312 = vmatpush3.bf16.msra.mxu0 %v348_v11  ;;  %329 = vmatprep.subr.bf16.mxu1 %v384_v1  ;;  %p368_p4 = pnand %p367_p3, %p361_p0 }
  0x1b   :  { %313 = vmatprep.subr.bf16.mxu0 %v384_v1 }
  0x1d   :  { %330 = vmatpush3.bf16.msra.mxu1 %v355_v15 }
  0x1e   :  { %314 = vmatpush3.bf16.msra.mxu0 %v349_v12  ;;  %331 = vmatprep.subr.bf16.mxu1 %v384_v1 }
  0x21   :  { %316 = vmatmul.mubr.bf16.vlgmr.msra.gmra.mrb[0].mxu0 %v22_v13  ;;  %332 = vmatpush3.bf16.msra.mxu1 %v356_v16 }
  0x22   :  { %333 = vmatprep.subr.bf16.mxu1 %v384_v1 }
  0x25   :  { %334 = vmatpush3.bf16.msra.mxu1 %v357_v17 }
  0xf4   :  { %v128_v19 = vpop.f32.mrb[0].mxu0 }
  0xf5   :  { %v129_v20 = vadd.f32 %v263_v18, %v128_v19  ;;  %v317_v21 = vpop.f32.mrb[1].mxu0 }
  0xf6   :  { %v131_v22 = vpop.f32.mrb[2].mxu0 }
  0xf7   :  { %358 = vtanh.f32 %v129_v20  ;;  %v318_v23 = vpop.f32.mrb[3].mxu0 }
 0x101   :  { %v359_v24 = vpop.eup %358 }
 0x102   :  { %v135_v25 = vpack.c.bf16 %v359_v24, %v359_v24 }
 0x104   :  { %336 = vmatmul.mubr.bf16.vlgmr.msra.gmra.mrb[0].mxu1 %v135_v25 }
 0x1d7   :  { %v241_v27 = vpop.f32.mrb[0].mxu1 }
 0x1d8   :  { %v242_v28 = vadd.f32 %v272_v26, %v241_v27  ;;  %v337_v29 = vpop.f32.mrb[1].mxu1 }
 0x1d9   :  { %v244_v30 = vpop.f32.mrb[2].mxu1 }
 0x1da   :  { %v247_v31 = vmax.f32 %v242_v28, 0.0  ;;  %v338_v32 = vpop.f32.mrb[3].mxu1 }
 0x1dc   :  { %248 = vst [vmem:[#allocation2] sm:$0x3] %v247_v31 }
 0x1dd   :  { %371 = shalt.err (!%p368_p4)
}
 0x1de   :  { %s372_s4 = scalar_lea.hbm %s491_s5, 32 }
 0x1df   :  { %p373_p5 = scmp.ne.s32.totalorder %s491_s5, %s372_s4  ;;  %p376_p6 = scmp.lt.u32.totalorder %s372_s4, %s491_s5 }
 0x1e1   :  { %p378_p7 = pnand %p376_p6, %p373_p5 }
 0x1e3   :  { %381 = shalt.err (!%p378_p7)
}
 0x1e4   :  { %258 = dma.vmem_to_hbm [thread:$0]  %s256_s29, 32, %s491_s5, [#allocation3]  }
 0x1e5   :  { %382 = dma.done.wait [#allocation3], 32  }
 0x1e6   :  { %383 = vsyncadd [#allocation3], 4294967264 }
 0x1e7   :  { %262 = vsyncpa [#allocation3], 1 }

</bundles_post_ra>
